<compile_context>
chip_gen: v7x
topology: tpu7x:2x2x1
jax: 0.10.0
libtpu: 0.0.40
codegen_flags: <defaults>
</compile_context>

<pallas_src>
import math
from functools import partial

import jax
import jax.numpy as jnp
from jax.experimental import pallas as pl
from jax.experimental.pallas import tpu as pltpu

H = 32              # n_hidden_units (module default)
NUM_TERMS = 16      # truncated ascending-series length (f32-accurate for |x| <~ 6)
LANE_CHUNK = 128    # points processed per in-kernel chunk (one full lane group)
# TODO(synk): for |x| >~ 8-10 the alternating ascending series loses f32 accuracy
#             vs scipy.special.jv; an asymptotic branch would be needed there.


# ----------------------------------------------------------------------------
# Bessel J_n via prefactor * polynomial in u = (x/2)^2
# ----------------------------------------------------------------------------

def _jn_coeffs(n, num_terms):
    """Python-float coefficients c_k = (-1)^k n! / (k! (k+n)!) of the poly in u."""
    return [((-1.0) ** k) * math.factorial(n)
            / (math.factorial(k) * math.factorial(k + n))
            for k in range(num_terms)]


def _poly_4way(u, coeffs):
    """sum_k coeffs[k] * u**k via 4 independent Horner chains in u^4 (Estrin).

    Breaks the serial dependency chain of plain Horner so the 4 VALU slots per
    bundle can overlap independent chains. Coefficients are Python floats, so
    they lower to immediate splats (no per-coefficient vector constants).
    """
    assert len(coeffs) >= 4
    u2 = u * u
    u4 = u2 * u2
    parts = []
    for j in range(4):
        cs = coeffs[j::4]
        acc = cs[-1]
        for c in reversed(cs[:-1]):
            acc = acc * u4 + c
        parts.append(acc)
    return parts[0] + u * parts[1] + u2 * (parts[2] + u * parts[3])


def _bessel_jn(n, x, num_terms=NUM_TERMS):
    """J_n(x) for a small Python int n (elementwise, VPU only)."""
    half = 0.5 * x
    u = half * half
    pref = half
    for _ in range(n - 1):
        pref = pref * half
    pref = pref * (1.0 / float(math.factorial(n)))
    return pref * _poly_4way(u, _jn_coeffs(n, num_terms))


# ----------------------------------------------------------------------------
# Parameter packing: one (H, 9) f32 column block, resident across grid steps.
#   col 0: w_j2   col 1: b_j2   col 2: w_j4   col 3: b_j4
#   col 4: wo2 = W_out[0, :H]   col 5: wo4 = W_out[0, H:]
#   col 6: w_sin  col 7: b_sin  col 8: b_out (broadcast down the column)
# ----------------------------------------------------------------------------

def _pack_params(params):
    w_sin, b_sin, w_j2, b_j2, w_j4, b_j4, w_out, b_out = params
    wo = w_out.reshape(2 * H)
    b_out_col = jnp.broadcast_to(jnp.reshape(b_out, ()).astype(jnp.float32), (H,))
    return jnp.stack(
        [w_j2.reshape(H), b_j2.reshape(H),
         w_j4.reshape(H), b_j4.reshape(H),
         wo[:H], wo[H:],
         w_sin.reshape(H), b_sin.reshape(H),
         b_out_col],
        axis=1).astype(jnp.float32)                      # (H, 9)


# ----------------------------------------------------------------------------
# Kernel (batch on lanes, H on sublanes)
# ----------------------------------------------------------------------------

def _fcnn_kernel(t_ref, wb_ref, o_ref):
    # t_ref : (2, tile)  row 0 = r, row 1 = theta (points on lanes)
    # wb_ref: (H, 9)     packed parameter columns (resident, one DMA total)
    # o_ref : (1, tile)  lane-dense output row
    w_j2 = wb_ref[:, 0:1]            # (H, 1)
    b_j2 = wb_ref[:, 1:2]
    w_j4 = wb_ref[:, 2:3]
    b_j4 = wb_ref[:, 3:4]
    wo2 = wb_ref[:, 4:5]
    wo4 = wb_ref[:, 5:6]
    w_sin = wb_ref[:, 6:7]
    b_sin = wb_ref[:, 7:8]
    b_out = wb_ref[0:1, 8:9]         # (1, 1)

    tile = t_ref.shape[1]
    # 128-lane chunks keep the 16-term Estrin evaluation (u, u^2, u^4, 4 Horner
    # accumulators, prefactor) well within the 64-vreg budget -> no spills.
    for c in range(tile // LANE_CHUNK):
        lo = c * LANE_CHUNK
        hi = lo + LANE_CHUNK
        r = t_ref[0:1, lo:hi]                            # (1, C)
        theta = t_ref[1:2, lo:hi]                        # (1, C)

        # sin branch: EUP work, reduced immediately to 1 vreg of live state.
        sin_v = jnp.sin(w_sin * theta + b_sin)           # (H, C)
        s = jnp.sum(sin_v, axis=0, keepdims=True)        # (1, C)  XLU sublane reduce

        # Bessel branches: dominant VALU work, lane-dense (H=32 on sublanes).
        j2 = _bessel_jn(2, w_j2 * r + b_j2)              # (H, C)
        acc = j2 * wo2                                   # fold before j4 -> low vreg pressure
        j4 = _bessel_jn(4, w_j4 * r + b_j4)              # (H, C)
        acc = acc + j4 * wo4
        p = jnp.sum(acc, axis=0, keepdims=True)          # (1, C)

        # torch: output(ger(sin, cat(j2, j4)).sum(0)) == sum(sin)*(j2.wo2 + j4.wo4) + b
        o_ref[0:1, lo:hi] = s * p + b_out


# ----------------------------------------------------------------------------
# Wrappers (jit'd so packing / padding / transpose are hoisted out of the
# per-call hot path)
# ----------------------------------------------------------------------------

@partial(jax.jit, static_argnames=("max_tile", "min_tiles"))
def fcnn_hetero_bessel_batched(t_batch, params, max_tile=1024, min_tiles=None):
    """Apply the per-point forward to every row of t_batch: (B, 2) -> (B, 1)."""
    b = t_batch.shape[0]
    if min_tiles is None:
        # One big grid step on single-TC chips (v5e/v6e); two steps once there
        # is enough work so v7x's 2 TensorCores both get a "parallel" slice.
        min_tiles = 1 if b <= LANE_CHUNK else 2
    tile = min(max_tile,
               pl.cdiv(pl.cdiv(b, min_tiles), LANE_CHUNK) * LANE_CHUNK)
    b_pad = pl.cdiv(b, tile) * tile
    num_tiles = b_pad // tile
    # VMEM per grid step is tiny ((2,tile)+(1,tile) f32 blocks, double-buffered,
    # plus the resident (H,9) params) -> no vmem_limit_bytes needed, even on v7x.

    wb = _pack_params(params)                            # (H, 9)
    t_t = t_batch.astype(jnp.float32).T                  # (2, B)  batch on lanes
    if b_pad != b:
        t_t = jnp.pad(t_t, ((0, 0), (0, b_pad - b)))

    out = pl.pallas_call(
        _fcnn_kernel,
        out_shape=jax.ShapeDtypeStruct((1, b_pad), jnp.float32),
        grid_spec=pltpu.PrefetchScalarGridSpec(
            num_scalar_prefetch=0,
            grid=(num_tiles,),
            in_specs=[pl.BlockSpec((2, tile), lambda i: (0, i)),
                      pl.BlockSpec((H, 9), lambda i: (0, 0))],   # resident params
            out_specs=pl.BlockSpec((1, tile), lambda i: (0, i))),
        compiler_params=pltpu.CompilerParams(
            dimension_semantics=("parallel",)),
    )(t_t, wb)
    return out[0, :b][:, None]                           # (B, 1)


def fcnn_hetero_bessel(t, params):
    """Exact module semantics: t is (1, 2) -> returns (1,) float32."""
    return fcnn_hetero_bessel_batched(t, params).reshape(1)


# ----------------------------------------------------------------------------
# Plain-JAX references (mirror the PyTorch forward; serial series recurrence)
# ----------------------------------------------------------------------------

def _bessel_j_series_ref(n, x, num_terms=NUM_TERMS):
    half = 0.5 * x
    half_sq = half * half
    p = jnp.ones_like(half)
    for _ in range(n):
        p = p * half
    term = p * (1.0 / float(math.factorial(n)))
    acc = term
    for k in range(1, num_terms):
        term = term * (-half_sq) * (1.0 / float(k * (k + n)))
        acc = acc + term
    return acc


def reference_batched(t, params):
    w_sin, b_sin, w_j2, b_j2, w_j4, b_j4, w_out, b_out = params
    r = t[:, 0:1]
    theta = t[:, 1:2]
    sin_v = jnp.sin(theta * w_sin.reshape(-1) + b_sin.reshape(-1))          # (B, H)
    j2 = _bessel_j_series_ref(2, r * w_j2.reshape(-1) + b_j2.reshape(-1))   # (B, H)
    j4 = _bessel_j_series_ref(4, r * w_j4.reshape(-1) + b_j4.reshape(-1))   # (B, H)
    wo = w_out.reshape(-1)
    p = j2 @ wo[:H] + j4 @ wo[H:]                                           # (B,)
    s = sin_v.sum(axis=1)                                                   # (B,)
    return (s * p + jnp.reshape(b_out, ()))[:, None]                        # (B, 1)


def reference_single(t, params):
    # Exact torch semantics for batch == 1 (module returns shape (1,)).
    return reference_batched(t, params)[0]


# ----------------------------------------------------------------------------

if __name__ == "__main__":
    key = jax.random.PRNGKey(0)
    ks = jax.random.split(key, 10)

    def uinit(k, shape, bound):
        return jax.random.uniform(k, shape, jnp.float32, -bound, bound)

    # PyTorch-native parameter shapes.
    # Linear(1, H): weight (H, 1), bias (H,), init bound 1/sqrt(1) = 1.
    w_sin = uinit(ks[0], (H, 1), 1.0)
    b_sin = uinit(ks[1], (H,), 1.0)
    w_j2 = uinit(ks[2], (H, 1), 1.0)
    b_j2 = uinit(ks[3], (H,), 1.0)
    w_j4 = uinit(ks[4], (H, 1), 1.0)
    b_j4 = uinit(ks[5], (H,), 1.0)
    # Linear(2H, 1): weight (1, 2H), bias (1,), bound 1/sqrt(2H).
    bound_out = 1.0 / math.sqrt(2 * H)
    w_out = uinit(ks[6], (1, 2 * H), bound_out)
    b_out = uinit(ks[7], (1,), bound_out)
    params = (w_sin, b_sin, w_j2, b_j2, w_j4, b_j4, w_out, b_out)

    # --- exact module semantics: batch == 1 -------------------------------
    t1 = jax.random.normal(ks[8], (1, 2), jnp.float32)
    out1 = jax.block_until_ready(fcnn_hetero_bessel(t1, params))
    ref1 = reference_single(t1, params)
    assert out1.shape == (1,), out1.shape
    assert jnp.allclose(out1, ref1, rtol=1e-4, atol=1e-5), (out1, ref1)

    # --- batched entry point: many collocation points per pallas_call -----
    B = 512
    tb = jax.random.normal(ks[9], (B, 2), jnp.float32)
    outb = jax.block_until_ready(fcnn_hetero_bessel_batched(tb, params))
    refb = reference_batched(tb, params)
    assert outb.shape == (B, 1), outb.shape
    assert jnp.allclose(outb, refb, rtol=1e-4, atol=1e-5), float(
        jnp.max(jnp.abs(outb - refb)))

    print("KERNEL_OK")
</pallas_src>

<mosaic_0001>
module attributes {stable_mosaic.version = 11 : i64} {
  func.func @_fcnn_kernel(%arg0: i32, %arg1: memref<2x128xf32, #tpu.memory_space<vmem>>, %arg2: memref<32x9xf32, #tpu.memory_space<vmem>>, %arg3: memref<1x128xf32, #tpu.memory_space<vmem>>) attributes {dimension_semantics = [#tpu.dimension_semantics<parallel>], iteration_bounds = array<i64: 1>, scalar_prefetch = 0 : i64, scratch_operands = 0 : i64, tpu.core_type = #tpu.core_type<tc>, window_params = [{transform_indices = @transform_0, window_bounds = array<i64: 2, 128>}, {pipeline_mode = #tpu.pipeline_mode<synchronous>, transform_indices = @transform_1, window_bounds = array<i64: 32, 9>}, {transform_indices = @transform_2, window_bounds = array<i64: 1, 128>}]} {
    %c0 = arith.constant 0 : index
    %c0_0 = arith.constant 0 : index
    %0 = vector.load %arg2[%c0, %c0_0] : memref<32x9xf32, #tpu.memory_space<vmem>>, vector<32x1xf32>
    %c0_1 = arith.constant 0 : index
    %c1 = arith.constant 1 : index
    %1 = vector.load %arg2[%c0_1, %c1] : memref<32x9xf32, #tpu.memory_space<vmem>>, vector<32x1xf32>
    %c0_2 = arith.constant 0 : index
    %c2 = arith.constant 2 : index
    %2 = vector.load %arg2[%c0_2, %c2] : memref<32x9xf32, #tpu.memory_space<vmem>>, vector<32x1xf32>
    %c0_3 = arith.constant 0 : index
    %c3 = arith.constant 3 : index
    %3 = vector.load %arg2[%c0_3, %c3] : memref<32x9xf32, #tpu.memory_space<vmem>>, vector<32x1xf32>
    %c0_4 = arith.constant 0 : index
    %c4 = arith.constant 4 : index
    %4 = vector.load %arg2[%c0_4, %c4] : memref<32x9xf32, #tpu.memory_space<vmem>>, vector<32x1xf32>
    %c0_5 = arith.constant 0 : index
    %c5 = arith.constant 5 : index
    %5 = vector.load %arg2[%c0_5, %c5] : memref<32x9xf32, #tpu.memory_space<vmem>>, vector<32x1xf32>
    %c0_6 = arith.constant 0 : index
    %c6 = arith.constant 6 : index
    %6 = vector.load %arg2[%c0_6, %c6] : memref<32x9xf32, #tpu.memory_space<vmem>>, vector<32x1xf32>
    %c0_7 = arith.constant 0 : index
    %c7 = arith.constant 7 : index
    %7 = vector.load %arg2[%c0_7, %c7] : memref<32x9xf32, #tpu.memory_space<vmem>>, vector<32x1xf32>
    %c0_8 = arith.constant 0 : index
    %c8 = arith.constant 8 : index
    %8 = vector.load %arg2[%c0_8, %c8] : memref<32x9xf32, #tpu.memory_space<vmem>>, vector<1x1xf32>
    %c0_9 = arith.constant 0 : index
    %c0_10 = arith.constant 0 : index
    %9 = vector.load %arg1[%c0_9, %c0_10] : memref<2x128xf32, #tpu.memory_space<vmem>>, vector<1x128xf32>
    %c1_11 = arith.constant 1 : index
    %c0_12 = arith.constant 0 : index
    %10 = vector.load %arg1[%c1_11, %c0_12] : memref<2x128xf32, #tpu.memory_space<vmem>>, vector<1x128xf32>
    %11 = vector.broadcast %6 : vector<32x1xf32> to vector<32x128xf32>
    %12 = vector.broadcast %10 : vector<1x128xf32> to vector<32x128xf32>
    %13 = arith.mulf %11, %12 : vector<32x128xf32>
    %14 = vector.broadcast %7 : vector<32x1xf32> to vector<32x128xf32>
    %15 = arith.addf %13, %14 : vector<32x128xf32>
    %16 = math.sin %15 : vector<32x128xf32>
    %cst = arith.constant dense<0.000000e+00> : vector<128xf32>
    %17 = vector.multi_reduction <add>, %16, %cst [0] : vector<32x128xf32> to vector<128xf32>
    %18 = vector.shape_cast %17 : vector<128xf32> to vector<1x128xf32>
    %19 = vector.broadcast %0 : vector<32x1xf32> to vector<32x128xf32>
    %20 = vector.broadcast %9 : vector<1x128xf32> to vector<32x128xf32>
    %21 = arith.mulf %19, %20 : vector<32x128xf32>
    %22 = vector.broadcast %1 : vector<32x1xf32> to vector<32x128xf32>
    %23 = arith.addf %21, %22 : vector<32x128xf32>
    %cst_13 = arith.constant 5.000000e-01 : f32
    %24 = vector.broadcast %cst_13 : f32 to vector<32x128xf32>
    %25 = arith.mulf %24, %23 : vector<32x128xf32>
    %26 = arith.mulf %25, %25 : vector<32x128xf32>
    %27 = arith.mulf %25, %25 : vector<32x128xf32>
    %cst_14 = arith.constant 5.000000e-01 : f32
    %28 = vector.broadcast %cst_14 : f32 to vector<32x128xf32>
    %29 = arith.mulf %27, %28 : vector<32x128xf32>
    %30 = arith.mulf %26, %26 : vector<32x128xf32>
    %31 = arith.mulf %30, %30 : vector<32x128xf32>
    %cst_15 = arith.constant 4.7894394E-20 : f32
    %32 = vector.broadcast %cst_15 : f32 to vector<32x128xf32>
    %33 = arith.mulf %32, %31 : vector<32x128xf32>
    %cst_16 = arith.constant 1.36693053E-11 : f32
    %34 = vector.broadcast %cst_16 : f32 to vector<32x128xf32>
    %35 = arith.addf %33, %34 : vector<32x128xf32>
    %36 = arith.mulf %35, %31 : vector<32x128xf32>
    %cst_17 = arith.constant 1.15740739E-4 : f32
    %37 = vector.broadcast %cst_17 : f32 to vector<32x128xf32>
    %38 = arith.addf %36, %37 : vector<32x128xf32>
    %39 = arith.mulf %38, %31 : vector<32x128xf32>
    %cst_18 = arith.constant 1.000000e+00 : f32
    %40 = vector.broadcast %cst_18 : f32 to vector<32x128xf32>
    %41 = arith.addf %39, %40 : vector<32x128xf32>
    %cst_19 = arith.constant -2.45612285E-22 : f32
    %42 = vector.broadcast %cst_19 : f32 to vector<32x128xf32>
    %43 = arith.mulf %42, %31 : vector<32x128xf32>
    %cst_20 = arith.constant -1.38073784E-13 : f32
    %44 = vector.broadcast %cst_20 : f32 to vector<32x128xf32>
    %45 = arith.addf %43, %44 : vector<32x128xf32>
    %46 = arith.mulf %45, %31 : vector<32x128xf32>
    %cst_21 = arith.constant -3.3068784E-6 : f32
    %47 = vector.broadcast %cst_21 : f32 to vector<32x128xf32>
    %48 = arith.addf %46, %47 : vector<32x128xf32>
    %49 = arith.mulf %48, %31 : vector<32x128xf32>
    %cst_22 = arith.constant -0.333333343 : f32
    %50 = vector.broadcast %cst_22 : f32 to vector<32x128xf32>
    %51 = arith.addf %49, %50 : vector<32x128xf32>
    %cst_23 = arith.constant 1.09648333E-24 : f32
    %52 = vector.broadcast %cst_23 : f32 to vector<32x128xf32>
    %53 = arith.mulf %52, %31 : vector<32x128xf32>
    %cst_24 = arith.constant 1.15061496E-15 : f32
    %54 = vector.broadcast %cst_24 : f32 to vector<32x128xf32>
    %55 = arith.addf %53, %54 : vector<32x128xf32>
    %56 = arith.mulf %55, %31 : vector<32x128xf32>
    %cst_25 = arith.constant 6.88932999E-8 : f32
    %57 = vector.broadcast %cst_25 : f32 to vector<32x128xf32>
    %58 = arith.addf %56, %57 : vector<32x128xf32>
    %59 = arith.mulf %58, %31 : vector<32x128xf32>
    %cst_26 = arith.constant 0.0416666679 : f32
    %60 = vector.broadcast %cst_26 : f32 to vector<32x128xf32>
    %61 = arith.addf %59, %60 : vector<32x128xf32>
    %cst_27 = arith.constant -4.29993481E-27 : f32
    %62 = vector.broadcast %cst_27 : f32 to vector<32x128xf32>
    %63 = arith.mulf %62, %31 : vector<32x128xf32>
    %cst_28 = arith.constant -8.04625796E-18 : f32
    %64 = vector.broadcast %cst_28 : f32 to vector<32x128xf32>
    %65 = arith.addf %63, %64 : vector<32x128xf32>
    %66 = arith.mulf %65, %31 : vector<32x128xf32>
    %cst_29 = arith.constant -1.09354437E-9 : f32
    %67 = vector.broadcast %cst_29 : f32 to vector<32x128xf32>
    %68 = arith.addf %66, %67 : vector<32x128xf32>
    %69 = arith.mulf %68, %31 : vector<32x128xf32>
    %cst_30 = arith.constant -0.00277777785 : f32
    %70 = vector.broadcast %cst_30 : f32 to vector<32x128xf32>
    %71 = arith.addf %69, %70 : vector<32x128xf32>
    %72 = arith.mulf %26, %51 : vector<32x128xf32>
    %73 = arith.addf %41, %72 : vector<32x128xf32>
    %74 = arith.mulf %26, %71 : vector<32x128xf32>
    %75 = arith.addf %61, %74 : vector<32x128xf32>
    %76 = arith.mulf %30, %75 : vector<32x128xf32>
    %77 = arith.addf %73, %76 : vector<32x128xf32>
    %78 = arith.mulf %29, %77 : vector<32x128xf32>
    %79 = vector.broadcast %4 : vector<32x1xf32> to vector<32x128xf32>
    %80 = arith.mulf %78, %79 : vector<32x128xf32>
    %81 = vector.broadcast %2 : vector<32x1xf32> to vector<32x128xf32>
    %82 = vector.broadcast %9 : vector<1x128xf32> to vector<32x128xf32>
    %83 = arith.mulf %81, %82 : vector<32x128xf32>
    %84 = vector.broadcast %3 : vector<32x1xf32> to vector<32x128xf32>
    %85 = arith.addf %83, %84 : vector<32x128xf32>
    %cst_31 = arith.constant 5.000000e-01 : f32
    %86 = vector.broadcast %cst_31 : f32 to vector<32x128xf32>
    %87 = arith.mulf %86, %85 : vector<32x128xf32>
    %88 = arith.mulf %87, %87 : vector<32x128xf32>
    %89 = arith.mulf %87, %87 : vector<32x128xf32>
    %90 = arith.mulf %89, %87 : vector<32x128xf32>
    %91 = arith.mulf %90, %87 : vector<32x128xf32>
    %cst_32 = arith.constant 0.0416666679 : f32
    %92 = vector.broadcast %cst_32 : f32 to vector<32x128xf32>
    %93 = arith.mulf %91, %92 : vector<32x128xf32>
    %94 = arith.mulf %88, %88 : vector<32x128xf32>
    %95 = arith.mulf %94, %94 : vector<32x128xf32>
    %cst_33 = arith.constant 2.39471978E-21 : f32
    %96 = vector.broadcast %cst_33 : f32 to vector<32x128xf32>
    %97 = arith.mulf %96, %95 : vector<32x128xf32>
    %cst_34 = arith.constant 1.24266407E-12 : f32
    %98 = vector.broadcast %cst_34 : f32 to vector<32x128xf32>
    %99 = arith.addf %97, %98 : vector<32x128xf32>
    %100 = arith.mulf %99, %95 : vector<32x128xf32>
    %cst_35 = arith.constant 2.48015876E-5 : f32
    %101 = vector.broadcast %cst_35 : f32 to vector<32x128xf32>
    %102 = arith.addf %100, %101 : vector<32x128xf32>
    %103 = arith.mulf %102, %95 : vector<32x128xf32>
    %cst_36 = arith.constant 1.000000e+00 : f32
    %104 = vector.broadcast %cst_36 : f32 to vector<32x128xf32>
    %105 = arith.addf %103, %104 : vector<32x128xf32>
    %cst_37 = arith.constant -1.0835836E-23 : f32
    %106 = vector.broadcast %cst_37 : f32 to vector<32x128xf32>
    %107 = arith.mulf %106, %95 : vector<32x128xf32>
    %cst_38 = arith.constant -1.06210605E-14 : f32
    %108 = vector.broadcast %cst_38 : f32 to vector<32x128xf32>
    %109 = arith.addf %107, %108 : vector<32x128xf32>
    %110 = arith.mulf %109, %95 : vector<32x128xf32>
    %cst_39 = arith.constant -5.511464E-7 : f32
    %111 = vector.broadcast %cst_39 : f32 to vector<32x128xf32>
    %112 = arith.addf %110, %111 : vector<32x128xf32>
    %113 = arith.mulf %112, %95 : vector<32x128xf32>
    %cst_40 = arith.constant -2.000000e-01 : f32
    %114 = vector.broadcast %cst_40 : f32 to vector<32x128xf32>
    %115 = arith.addf %113, %114 : vector<32x128xf32>
    %cst_41 = arith.constant 4.29993473E-26 : f32
    %116 = vector.broadcast %cst_41 : f32 to vector<32x128xf32>
    %117 = arith.mulf %116, %95 : vector<32x128xf32>
    %cst_42 = arith.constant 7.58647177E-17 : f32
    %118 = vector.broadcast %cst_42 : f32 to vector<32x128xf32>
    %119 = arith.addf %117, %118 : vector<32x128xf32>
    %120 = arith.mulf %119, %95 : vector<32x128xf32>
    %cst_43 = arith.constant 9.18577303E-9 : f32
    %121 = vector.broadcast %cst_43 : f32 to vector<32x128xf32>
    %122 = arith.addf %120, %121 : vector<32x128xf32>
    %123 = arith.mulf %122, %95 : vector<32x128xf32>
    %cst_44 = arith.constant 0.0166666675 : f32
    %124 = vector.broadcast %cst_44 : f32 to vector<32x128xf32>
    %125 = arith.addf %123, %124 : vector<32x128xf32>
    %cst_45 = arith.constant -1.50874908E-28 : f32
    %126 = vector.broadcast %cst_45 : f32 to vector<32x128xf32>
    %127 = arith.mulf %126, %95 : vector<32x128xf32>
    %cst_46 = arith.constant -4.59786172E-19 : f32
    %128 = vector.broadcast %cst_46 : f32 to vector<32x128xf32>
    %129 = arith.addf %127, %128 : vector<32x128xf32>
    %130 = arith.mulf %129, %95 : vector<32x128xf32>
    %cst_47 = arith.constant -1.19295754E-10 : f32
    %131 = vector.broadcast %cst_47 : f32 to vector<32x128xf32>
    %132 = arith.addf %130, %131 : vector<32x128xf32>
    %133 = arith.mulf %132, %95 : vector<32x128xf32>
    %cst_48 = arith.constant -7.93650805E-4 : f32
    %134 = vector.broadcast %cst_48 : f32 to vector<32x128xf32>
    %135 = arith.addf %133, %134 : vector<32x128xf32>
    %136 = arith.mulf %88, %115 : vector<32x128xf32>
    %137 = arith.addf %105, %136 : vector<32x128xf32>
    %138 = arith.mulf %88, %135 : vector<32x128xf32>
    %139 = arith.addf %125, %138 : vector<32x128xf32>
    %140 = arith.mulf %94, %139 : vector<32x128xf32>
    %141 = arith.addf %137, %140 : vector<32x128xf32>
    %142 = arith.mulf %93, %141 : vector<32x128xf32>
    %143 = vector.broadcast %5 : vector<32x1xf32> to vector<32x128xf32>
    %144 = arith.mulf %142, %143 : vector<32x128xf32>
    %145 = arith.addf %80, %144 : vector<32x128xf32>
    %cst_49 = arith.constant dense<0.000000e+00> : vector<128xf32>
    %146 = vector.multi_reduction <add>, %145, %cst_49 [0] : vector<32x128xf32> to vector<128xf32>
    %147 = vector.shape_cast %146 : vector<128xf32> to vector<1x128xf32>
    %148 = arith.mulf %18, %147 : vector<1x128xf32>
    %149 = vector.broadcast %8 : vector<1x1xf32> to vector<1x128xf32>
    %150 = arith.addf %148, %149 : vector<1x128xf32>
    %c0_50 = arith.constant 0 : index
    %c0_51 = arith.constant 0 : index
    %151 = vector.load %arg3[%c0_50, %c0_51] : memref<1x128xf32, #tpu.memory_space<vmem>>, vector<1x128xf32>
    tpu.vector_store %arg3[%c0_50, %c0_51], %150 {strides = array<i32>} : memref<1x128xf32, #tpu.memory_space<vmem>>, vector<1x128xf32>,
    return
  }
  func.func @transform_0(%arg0: i32) -> (i32, i32) {
    %c0_i32 = arith.constant 0 : i32
    %c0_i32_0 = arith.constant 0 : i32
    return %c0_i32, %arg0 : i32, i32
  }
  func.func @transform_1(%arg0: i32) -> (i32, i32) {
    %c0_i32 = arith.constant 0 : i32
    %c0_i32_0 = arith.constant 0 : i32
    %c0_i32_1 = arith.constant 0 : i32
    return %c0_i32, %c0_i32_0 : i32, i32
  }
  func.func @transform_2(%arg0: i32) -> (i32, i32) {
    %c0_i32 = arith.constant 0 : i32
    %c0_i32_0 = arith.constant 0 : i32
    return %c0_i32, %arg0 : i32, i32
  }
}

</mosaic_0001>

<bundles_post_ra>
// kernel: fcnn_hetero_bessel_batched.1
= control target key start
LH: loop header
LB: loop body
LE: loop exit
PB: predicated region body
PF: predicated region fallthrough
CT: control target
= control target key end

     0   :  { %v1062_v2 = vmov 6   ;;  %s1836_s0 = inlined_call_operand.vmem [shape: f32[2,128], index: 0, kind: input, shape index: {}]   ;;  %s1837_s1 = inlined_call_operand.vmem [shape: f32[32,9], index: 1, kind: input, shape index: {}]   ;;  %s1838_s2 = inlined_call_operand.hbm [shape: f32[1,128], index: 2, kind: output, shape index: {}]  }
   0x1   :  { %v1096_v0 = vld [vmem:[%s1837_s1 + $0x10] sm:$0xff]  ;;  %v12_v1 = vld [vmem:[%s1837_s1] sm:$0xff]  ;;  %998 = vset.pattern.permute.xlu1 %v1062_v2  ;;  %997 = vset.pattern.permute.xlu0 %v1062_v2  ;;  %v13_v3 = vld [vmem:[%s1837_s1 + $0x8] sm:$0xff] }
   0x2   :  { %31 = vperm.xlu1 %998, %v1096_v0   ;;  %21 = vperm.xlu0 %997, %v12_v1  }
   0x3   :  { %7 = vsyncpa [#allocation3], 0  ;;  %v1063_v4 = vmov 7   ;;  %v15_v5 = vld [vmem:[%s1837_s1 + $0x18] sm:$0xff]  ;;  %v1064_v6 = vmov 0   ;;  %v1065_v7 = vmov 2  }
   0x4   :  { %v1066_v8 = vmov 1   ;;  %v1067_v9 = vmov 3   ;;  %v1068_v10 = vmov 5   ;;  %v1069_v11 = vmov 8   ;;  %v16_v13 = vld [vmem:[%s1837_s1] sm:$0x1] }
   0x5   :  { %v1070_v12 = vmov 4   ;;  %v1123_v16 = vld [vmem:[%s1836_s0 + $0x1] ss:$0 sm:$0xff]  ;;  %v1071_v47 = vmov 683565275  }
   0x6   :  { %999 = vset.pattern.permute.xlu1 %v1063_v4  ;;  %26 = vperm.xlu0 %997, %v13_v3   ;;  %v1072_v49 = vmov 2475754826   ;;  %v1073_v52 = vmov 2131351028   ;;  %v1074_v54 = vmov 2102212464  }
   0x7   :  { %48 = vperm.xlu1 %999, %v12_v1   ;;  %v1075_v56 = vmov 920167782   ;;  %v1076_v63 = vmov 1326507024  }
   0xa   :  { %1000 = vset.pattern.permute.xlu0 %v1063_v4 }
   0xb   :  { %1001 = vset.pattern.permute.xlu1 %v1062_v2  ;;  %52 = vperm.xlu0 %1000, %v13_v3  }
   0xc   :  { %36 = vperm.xlu1 %1001, %v15_v5  }
   0xf   :  { %60 = vperm.xlu0 %1000, %v15_v5  }
  0x10   :  { %1002 = vset.pattern.permute.xlu1 %v1063_v4 }
  0x11   :  { %56 = vperm.xlu1 %1002, %v1096_v0  }
  0x13   :  { %1004 = vset.pattern.permute.xlu0 %v1064_v6 }
  0x14   :  { %497 = vperm.xlu0 %1004, %v13_v3  }
  0x15   :  { %1003 = vset.pattern.permute.xlu1 %v1064_v6 }
  0x16   :  { %493 = vperm.xlu1 %1003, %v12_v1  }
  0x18   :  { %501 = vperm.xlu0 %1004, %v1096_v0  }
  0x1a   :  { %1005 = vset.pattern.permute.xlu1 %v1065_v7 }
  0x1b   :  { %701 = vperm.xlu1 %1005, %v12_v1  }
  0x1c   :  { %1007 = vset.pattern.permute.xlu0 %v1066_v8 }
  0x1d   :  { %521 = vperm.xlu0 %1007, %v13_v3  }
  0x1f   :  { %705 = vperm.xlu1 %1005, %v13_v3  }
  0x21   :  { %1012 = vset.pattern.permute.xlu0 %v1065_v7 }
  0x22   :  { %713 = vperm.xlu0 %1012, %v15_v5  }
  0x23   :  { %1006 = vset.pattern.permute.xlu1 %v1066_v8 }
  0x24   :  { %517 = vperm.xlu1 %1006, %v12_v1  }
  0x26   :  { %1013 = vset.pattern.permute.xlu0 %v1067_v9 }
  0x27   :  { %725 = vperm.xlu0 %1013, %v13_v3  }
  0x28   :  { %1008 = vset.pattern.permute.xlu1 %v1065_v7 }
  0x29   :  { %709 = vperm.xlu1 %1008, %v1096_v0  }
  0x2b   :  { %733 = vperm.xlu0 %1013, %v15_v5  }
  0x2d   :  { %1009 = vset.pattern.permute.xlu1 %v1067_v9 }
  0x2e   :  { %721 = vperm.xlu1 %1009, %v12_v1  }
  0x2f   :  { %1017 = vset.pattern.permute.xlu0 %v1068_v10 }
  0x30   :  { %893 = vperm.xlu0 %1017, %v12_v1  }
  0x32   :  { %1010 = vset.pattern.permute.xlu1 %v1064_v6 }
  0x33   :  { %505 = vperm.xlu1 %1010, %v15_v5  }
  0x34   :  { %901 = vperm.xlu0 %1017, %v1096_v0  }
  0x37   :  { %1011 = vset.pattern.permute.xlu1 %v1066_v8 }
  0x38   :  { %525 = vperm.xlu1 %1011, %v1096_v0   ;;  %905 = vperm.xlu0 %1017, %v15_v5  }
  0x3c   :  { %1014 = vset.pattern.permute.xlu1 %v1067_v9  ;;  %1021 = vset.pattern.permute.xlu0 %v1069_v11 }
  0x3d   :  { %729 = vperm.xlu1 %1014, %v1096_v0  }
  0x41   :  { %1015 = vset.pattern.permute.xlu1 %v1066_v8 }
  0x42   :  { %529 = vperm.xlu1 %1015, %v15_v5  }
  0x46   :  { %1016 = vset.pattern.permute.xlu1 %v1070_v12 }
  0x47   :  { %681 = vperm.xlu1 %1016, %v12_v1  }
  0x4b   :  { %685 = vperm.xlu1 %1016, %v13_v3  }
  0x4f   :  { %1018 = vset.pattern.permute.xlu1 %v1068_v10 }
  0x50   :  { %897 = vperm.xlu1 %1018, %v13_v3  }
  0x54   :  { %1019 = vset.pattern.permute.xlu1 %v1070_v12 }
  0x55   :  { %689 = vperm.xlu1 %1019, %v1096_v0  }
  0x59   :  { %693 = vperm.xlu1 %1019, %v15_v5  }
  0x5d   :  { %1020 = vset.pattern.permute.xlu1 %v1069_v11 }
  0x5e   :  { %928 = vperm.xlu1 %1020, %v16_v13  }
  0x81   :  { %v1118_v14 = vpop.permute.xlu1 %31  ;;  %v22_v15 = vpop.permute.xlu0 %21 }
  0x82   :  { %v43_v17 = vmul.f32 %v1123_v16, %v22_v15 }
  0x85   :  { %v27_v18 = vpop.permute.xlu0 %26 }
  0x86   :  { %v49_v19 = vpop.permute.xlu1 %48  ;;  %v44_v23 = vmul.f32 %v1123_v16, %v27_v18 }
  0x87   :  { %v1126_v20 = vadd.f32 %v49_v19, %v43_v17 }
  0x89   :  { %v67_v21 = vand.u32 2147483647, %v1126_v20  ;;  %v70_v22 = vand.u32 2139095040, %v1126_v20  ;;  %vm69_vm13 = vcmp.lt.s32.totalorder %v1126_v20, 0 }
  0x8a   :  { %v53_v24 = vpop.permute.xlu0 %52 }
  0x8b   :  { %v71_v25 = vshrl.u32 %v70_v22, 23  ;;  %v1131_v26 = vadd.f32 %v53_v24, %v44_v23  ;;  %v37_v27 = vpop.permute.xlu1 %36  ;;  %v74_v28 = vand.u32 8388607, %v67_v21  ;;  %vm1223_vm14 = vcmp.le.f32.partialorder %v67_v21, 0.7853982 }
  0x8c   :  { %v46_v29 = vmul.f32 %v1123_v16, %v37_v27 }
  0x8d   :  { %v948_v30 = vadd.s32 4294967169, %v71_v25  ;;  %v171_v31 = vand.u32 2147483647, %v1131_v26  ;;  %v174_v32 = vand.u32 2139095040, %v1131_v26  ;;  %v75_v35 = vor.u32 8388608, %v74_v28 }
  0x8e   :  { %v61_v33 = vpop.permute.xlu0 %60  ;;  %vm173_vm15 = vcmp.lt.s32.totalorder %v1131_v26, 0 }
  0x8f   :  { %v77_v34 = vadd.s32 1, %v948_v30  ;;  %v175_v36 = vshrl.u32 %v174_v32, 23  ;;  %v178_v37 = vand.u32 8388607, %v171_v31  ;;  %v1140_v38 = vadd.f32 %v61_v33, %v46_v29 }
  0x90   :  { %v1142_v43 = vshll.u32 %v75_v35, 8 }
  0x91   :  { %vm78_vm0 = vcmp.gt.s32.totalorder %v77_v34, 0  ;;  %v952_v40 = vadd.s32 4294967169, %v175_v36  ;;  %v179_v44 = vor.u32 8388608, %v178_v37  ;;  %v382_v45 = vand.u32 2139095040, %v1140_v38 }
  0x92   :  { %v79_v39 = vsel %vm78_vm0, %v77_v34, 0  ;;  %v379_v25 = vand.u32 2147483647, %v1140_v38 }
  0x93   :  { %v80_v41 = vshrl.u32 %v79_v39, 5  ;;  %v81_v42 = vand.u32 31, %v79_v39  ;;  %v181_v51 = vadd.s32 1, %v952_v40  ;;  %v1176_v34 = vshll.u32 %v179_v44, 8 }
  0x94   :  { %v383_v35 = vshrl.u32 %v382_v45, 23 }
  0x95   :  { %v82_v46 = vsub.s32 32, %v81_v42  ;;  %v84_v48 = vshll.u32 %v1071_v47, %v81_v42  ;;  %v87_v50 = vshll.u32 %v1072_v49, %v81_v42  ;;  %v90_v53 = vshll.u32 %v1073_v52, %v81_v42 }
  0x96   :  { %v93_v55 = vshll.u32 %v1074_v54, %v81_v42  ;;  %v96_v57 = vshll.u32 %v1075_v56, %v81_v42  ;;  %vm99_vm1 = vcmp.lt.s32.totalorder %v80_v41, 1  ;;  %vm100_vm2 = vcmp.lt.s32.totalorder %v80_v41, 2 }
  0x97   :  { %v85_v58 = vshrl.u32 %v1072_v49, %v82_v46  ;;  %v88_v59 = vshrl.u32 %v1073_v52, %v82_v46  ;;  %v91_v60 = vshrl.u32 %v1074_v54, %v82_v46  ;;  %v83_v61 = vshrl.u32 %v1071_v47, %v82_v46 }
  0x98   :  { %v94_v62 = vshrl.u32 %v1075_v56, %v82_v46  ;;  %v97_v0 = vshrl.u32 %v1076_v63, %v82_v46  ;;  %vm101_vm3 = vcmp.lt.s32.totalorder %v80_v41, 3  ;;  %vm182_vm4 = vcmp.gt.s32.totalorder %v181_v51, 0 }
  0x99   :  { %v86_v1 = vor.u32 %v85_v58, %v84_v48  ;;  %v89_v2 = vor.u32 %v88_v59, %v87_v50  ;;  %v92_v3 = vor.u32 %v91_v60, %v90_v53  ;;  %vm102_vm5 = vcmp.lt.s32.totalorder %v80_v41, 4 }
  0x9a   :  { %v95_v4 = vor.u32 %v94_v62, %v93_v55  ;;  %v98_v5 = vor.u32 %v97_v0, %v96_v57  ;;  %v183_v6 = vsel %vm182_vm4, %v181_v51, 0 }
  0x9b   :  { %v103_v7 = vsel %vm99_vm1, %v83_v61, %v86_v1  ;;  %v104_v8 = vsel %vm102_vm5, %v92_v3, 2102212464  ;;  %v107_v9 = vsel %vm99_vm1, %v86_v1, %v89_v2  ;;  %v111_v10 = vsel %vm99_vm1, %v89_v2, %v92_v3 }
  0x9c   :  { %v105_v11 = vsel %vm101_vm3, %v89_v2, %v104_v8  ;;  %v108_v12 = vsel %vm102_vm5, %v95_v4, 920167782  ;;  %v112_v13 = vsel %vm102_vm5, %v98_v5, 1326507024  ;;  %v184_v15 = vshrl.u32 %v183_v6, 5 }
  0x9d   :  { %v106_v17 = vsel %vm100_vm2, %v103_v7, %v105_v11  ;;  %v109_v18 = vsel %vm101_vm3, %v92_v3, %v108_v12  ;;  %v113_v19 = vsel %vm101_vm3, %v95_v4, %v112_v13  ;;  %v185_v22 = vand.u32 31, %v183_v6 }
  0x9e   :  { %v110_v23 = vsel %vm100_vm2, %v107_v9, %v109_v18  ;;  %v114_v24 = vsel %vm100_vm2, %v111_v10, %v113_v19  ;;  %v122_v32 = vmul.u32 %v1142_v43, %v106_v17  ;;  %vm203_vm6 = vcmp.lt.s32.totalorder %v184_v15, 1 }
  0x9f   :  { %v1167_v27 = vmul.u32.u64.low %v1142_v43, %v114_v24  ;;  %v1168_v28 = vmul.u32.u64.high %v1142_v43, %v114_v24, %v1167_v27  ;;  %v1171_v29 = vmul.u32.u64.low %v1142_v43, %v110_v23  ;;  %v1172_v30 = vmul.u32.u64.high %v1142_v43, %v110_v23, %v1171_v29 }
  0xa0   :  { %v186_v33 = vsub.s32 32, %v185_v22  ;;  %v188_v36 = vshll.u32 %v1071_v47, %v185_v22  ;;  %v191_v37 = vshll.u32 %v1072_v49, %v185_v22  ;;  %v194_v39 = vshll.u32 %v1073_v52, %v185_v22  ;;  %v57_v27 = vpop.permute.xlu1 %56 }
  0xa1   :  { %v197_v46 = vshll.u32 %v1074_v54, %v185_v22  ;;  %vm124_vm7 = vc.u32 %v1168_v28, %v1171_v29  ;;  %v125_v43 = vadd.s32 1, %v1172_v30  ;;  %v200_v45 = vshll.u32 %v1075_v56, %v185_v22 }
  0xa2   :  { %v189_v40 = vshrl.u32 %v1072_v49, %v186_v33  ;;  %v192_v41 = vshrl.u32 %v1073_v52, %v186_v33  ;;  %v195_v42 = vshrl.u32 %v1074_v54, %v186_v33  ;;  %v198_v44 = vshrl.u32 %v1075_v56, %v186_v33 }
  0xa3   :  { %v201_v53 = vshrl.u32 %v1076_v63, %v186_v33  ;;  %v126_v55 = vsel %vm124_vm7, %v125_v43, %v1172_v30  ;;  %vm205_vm8 = vcmp.lt.s32.totalorder %v184_v15, 3  ;;  %vm206_vm9 = vcmp.lt.s32.totalorder %v184_v15, 4 }
  0xa4   :  { %v190_v48 = vor.u32 %v189_v40, %v188_v36  ;;  %v193_v50 = vor.u32 %v192_v41, %v191_v37  ;;  %v196_v51 = vor.u32 %v195_v42, %v194_v39  ;;  %v199_v57 = vor.u32 %v198_v44, %v197_v46  ;;  %v1233_v44 = vld [vmem:[%s1836_s0] ss:$0 sm:$0xff]  ;;  %s1077_s0 = smov [#allocation2]  }
  0xa5   :  { %v127_v58 = vadd.s32 %v126_v55, %v122_v32  ;;  %v187_v59 = vshrl.u32 %v1071_v47, %v186_v33  ;;  %v202_v60 = vor.u32 %v201_v53, %v200_v45  ;;  %v960_v2 = vadd.s32 4294967169, %v383_v35  ;;  %s939_s22 = sshll.u32 %s1077_s0, 4  ;;  %s940_s22 = int_to_ptr.vmem [resolvable:$true] %s939_s22 }
  0xa6   :  { %v208_v61 = vsel %vm206_vm9, %v196_v51, 2102212464  ;;  %v211_v62 = vsel %vm203_vm6, %v190_v48, %v193_v50  ;;  %v212_v0 = vsel %vm206_vm9, %v199_v57, 920167782  ;;  %v215_v1 = vsel %vm203_vm6, %v193_v50, %v196_v51  ;;  %s1038_s23 = scalar_lea.vmem %s940_s22, 16  ;;  %s1042_s24 = scalar_lea.vmem %s940_s22, 32 }
  0xa7   :  { %v128_v3 = vadd.s32 536870912, %v127_v58  ;;  %vm204_vm10 = vcmp.lt.s32.totalorder %v184_v15, 2  ;;  %v213_v4 = vsel %vm205_vm8, %v196_v51, %v212_v0  ;;  %v216_v5 = vsel %vm206_vm9, %v202_v60, 1326507024  ;;  %v498_v51 = vpop.permute.xlu0 %497  ;;  %p1039_p0 = scmp.ne.s32.totalorder %s940_s22, %s1038_s23  ;;  %p1043_p1 = scmp.lt.s32.totalorder %s940_s22, %s940_s22 }
  0xa8   :  { %v207_v6 = vsel %vm203_vm6, %v187_v59, %v190_v48  ;;  %v209_v7 = vsel %vm205_vm8, %v193_v50, %v208_v61  ;;  %v214_v8 = vsel %vm204_vm10, %v211_v62, %v213_v4  ;;  %v217_v9 = vsel %vm205_vm8, %v199_v57, %v216_v5  ;;  %p1044_p2 = scmp.lt.s32.totalorder %s1042_s24, %s1038_s23 }
  0xa9   :  { %v129_v10 = vshrl.u32 %v128_v3, 30  ;;  %v218_v11 = vsel %vm204_vm10, %v215_v1, %v217_v9  ;;  %v1200_v12 = vmul.u32.u64.low %v1176_v34, %v214_v8  ;;  %v1201_v13 = vmul.u32.u64.high %v1176_v34, %v214_v8, %v1200_v12 }
  0xaa   :  { %v1204_v17 = vmul.u32.u64.low %v1176_v34, %v218_v11  ;;  %v1205_v18 = vmul.u32.u64.high %v1176_v34, %v218_v11, %v1204_v17  ;;  %v386_v19 = vand.u32 8388607, %v379_v25  ;;  %v389_v22 = vadd.s32 1, %v960_v2  ;;  %p1045_p3 = por %p1044_p2, %p1043_p1 }
  0xab   :  { %v130_v23 = vshll.u32 %v129_v10, 30  ;;  %v210_v24 = vsel %vm204_vm10, %v207_v6, %v209_v7  ;;  %v45_v15 = vmul.f32 %v1123_v16, %v1118_v14  ;;  %v229_v32 = vadd.s32 1, %v1201_v13  ;;  %v1262_v6 = vpop.permute.xlu1 %493 }
  0xac   :  { %vm390_vm11 = vcmp.gt.s32.totalorder %v389_v22, 0  ;;  %v226_v35 = vmul.u32 %v1176_v34, %v210_v24  ;;  %vm228_vm12 = vc.u32 %v1205_v18, %v1200_v12  ;;  %v387_v36 = vor.u32 8388608, %v386_v19  ;;  %p1046_p4 = pnand %p1045_p3, %p1039_p0 }
  0xad   :  { %v1211_v30 = vsub.s32 %v127_v58, %v130_v23  ;;  %v391_v33 = vsel %vm390_vm11, %v389_v22, 0  ;;  %v1216_v37 = vadd.f32 %v57_v27, %v45_v15  ;;  %v153_v40 = vsub.s32 4, %v129_v10 }
  0xae   :  { %v230_v41 = vsel %vm228_vm12, %v229_v32, %v1201_v13  ;;  %v393_v42 = vand.u32 31, %v391_v33  ;;  %v123_v34 = vadd.s32 %v1171_v29, %v1168_v28  ;;  %v1235_v48 = vshll.u32 %v387_v36, 8 }
  0xaf   :  { %v133_v39 = vsub.s32 0, %v1211_v30  ;;  %v231_v14 = vadd.s32 %v230_v41, %v226_v35  ;;  %v275_v50 = vand.u32 2147483647, %v1216_v37  ;;  %v278_v21 = vand.u32 2139095040, %v1216_v37 }
  0xb0   :  { %v394_v43 = vsub.s32 32, %v393_v42  ;;  %v1241_v28 = vsel %vm69_vm13, %v153_v40, %v129_v10  ;;  %v1243_v29 = vshrl.u32 %v391_v33, 5  ;;  %v1246_v55 = vmul.f32 %v1233_v44, %v498_v51  ;;  %v1285_v40 = vpop.permute.xlu1 %701 }
  0xb1   :  { %v949_v46 = vmin.u32 %v133_v39, %v1211_v30  ;;  %v232_v45 = vadd.s32 536870912, %v231_v14  ;;  %v396_v58 = vshll.u32 %v1071_v47, %v393_v42  ;;  %v399_v62 = vshll.u32 %v1072_v49, %v393_v42 }
  0xb2   :  { %v397_v59 = vshrl.u32 %v1072_v49, %v394_v43  ;;  %v400_v60 = vshrl.u32 %v1073_v52, %v394_v43  ;;  %v403_v0 = vshrl.u32 %v1074_v54, %v394_v43  ;;  %v406_v1 = vshrl.u32 %v1075_v56, %v394_v43 }
  0xb3   :  { %v135_v53 = vclz %v949_v46  ;;  %v233_v57 = vshrl.u32 %v232_v45, 30  ;;  %v156_v2 = vsel %vm1223_vm14, 0, %v1241_v28  ;;  %v1259_v3 = vadd.s32 %v1200_v12, %v1205_v18 }
  0xb4   :  { %v405_v5 = vshll.u32 %v1074_v54, %v393_v42  ;;  %v398_v7 = vor.u32 %v397_v59, %v396_v58  ;;  %v401_v8 = vor.u32 %v400_v60, %v399_v62  ;;  %v402_v9 = vshll.u32 %v1073_v52, %v393_v42 }
  0xb5   :  { %v950_v61 = vadd.s32 4294967294, %v135_v53  ;;  %v234_v4 = vshll.u32 %v233_v57, 30  ;;  %v409_v17 = vshrl.u32 %v1076_v63, %v394_v43  ;;  %vm1270_vm1 = vcmp.le.f32.partialorder %v171_v31, 0.7853982 }
  0xb6   :  { %v407_v13 = vor.u32 %v406_v1, %v405_v5  ;;  %v404_v18 = vor.u32 %v403_v0, %v402_v9  ;;  %vm411_vm2 = vcmp.lt.s32.totalorder %v1243_v29, 1  ;;  %v257_v24 = vsub.s32 4, %v233_v57  ;;  %v502_v5 = vpop.permute.xlu0 %501 }
  0xb7   :  { %vm951_vm0 = vcmp.lt.s32.totalorder %v950_v61, 0  ;;  %v1265_v11 = vsub.s32 %v231_v14, %v234_v4  ;;  %v408_v27 = vshll.u32 %v1075_v56, %v393_v42  ;;  %vm413_vm3 = vcmp.lt.s32.totalorder %v1243_v29, 3 }
  0xb8   :  { %v138_v10 = vsel %vm951_vm0, 0, %v950_v61  ;;  %vm414_vm4 = vcmp.lt.s32.totalorder %v1243_v29, 4  ;;  %v419_v36 = vsel %vm411_vm2, %v398_v7, %v401_v8  ;;  %v395_v14 = vshrl.u32 %v1071_v47, %v394_v43 }
  0xb9   :  { %v139_v19 = vsub.s32 32, %v138_v10  ;;  %v143_v22 = vsub.s32 4294967266, %v138_v10  ;;  %v237_v23 = vsub.s32 0, %v1265_v11  ;;  %v140_v15 = vshll.u32 %v1211_v30, %v138_v10 }
  0xba   :  { %v410_v35 = vor.u32 %v409_v17, %v408_v27  ;;  %v420_v39 = vsel %vm414_vm4, %v407_v13, 920167782  ;;  %v258_v46 = vsel %vm173_vm15, %v257_v24, %v233_v57  ;;  %vm412_vm5 = vcmp.lt.s32.totalorder %v1243_v29, 2  ;;  %v1317_v17 = vpop.permute.xlu1 %705  ;;  %v522_v28 = vpop.permute.xlu0 %521 }
  0xbb   :  { %v141_v32 = vshrl.u32 %v123_v34, %v139_v19  ;;  %v144_v33 = vadd.s32 127, %v143_v22  ;;  %v953_v31 = vmin.u32 %v237_v23, %v1265_v11  ;;  %v421_v30 = vsel %vm413_vm3, %v404_v18, %v420_v39 }
  0xbc   :  { %v416_v45 = vsel %vm414_vm4, %v404_v18, 2102212464  ;;  %v415_v53 = vsel %vm411_vm2, %v395_v14, %v398_v7  ;;  %v422_v58 = vsel %vm412_vm5, %v419_v36, %v421_v30  ;;  %v423_v43 = vsel %vm411_vm2, %v401_v8, %v404_v18 }
  0xbd   :  { %v142_v41 = vor.u32 %v141_v32, %v140_v15  ;;  %v145_v42 = vshll.u32 %v144_v33, 23  ;;  %v239_v34 = vclz %v953_v31  ;;  %v424_v60 = vsel %vm414_vm4, %v410_v35, 1326507024 }
  0xbe   :  { %v1304_v57 = vmul.u32.u64.low %v1235_v48, %v422_v58  ;;  %v1305_v61 = vmul.u32.u64.high %v1235_v48, %v422_v58, %v1304_v57  ;;  %v417_v1 = vsel %vm413_vm3, %v401_v8, %v416_v45  ;;  %v425_v4 = vsel %vm413_vm3, %v407_v13, %v424_v60 }
  0xbf   :  { %v146_v51 = vor.u32 4788187, %v145_v42  ;;  %v954_v59 = vadd.s32 4294967294, %v239_v34  ;;  %v149_v0 = vcvt.s32.f32 %v142_v41  ;;  %v260_v7 = vsel %vm1270_vm1, 0, %v258_v46 }
  0xc0   :  { %v426_v9 = vsel %vm412_vm5, %v423_v43, %v425_v4  ;;  %v279_v10 = vshrl.u32 %v278_v21, 23  ;;  %v418_v24 = vsel %vm412_vm5, %v415_v53, %v417_v1  ;;  %v437_v27 = vadd.s32 1, %v1305_v61 }
  0xc1   :  { %v147_v62 = vand.u32 2147483647, %v146_v51  ;;  %vm955_vm6 = vcmp.lt.s32.totalorder %v954_v59, 0  ;;  %v1320_v8 = vmul.u32.u64.low %v1235_v48, %v426_v9  ;;  %v1321_v18 = vmul.u32.u64.high %v1235_v48, %v426_v9, %v1320_v8 }
  0xc2   :  { %v242_v22 = vsel %vm955_vm6, 0, %v954_v59  ;;  %v160_v21 = vadd.s32 3, %v156_v2  ;;  %v956_v32 = vadd.s32 4294967169, %v279_v10  ;;  %v282_v33 = vand.u32 8388607, %v275_v50 }
  0xc3   :  { %v150_v19 = vmul.f32 %v149_v0, %v147_v62  ;;  %v243_v13 = vsub.s32 32, %v242_v22  ;;  %v247_v23 = vsub.s32 4294967266, %v242_v22  ;;  %v244_v31 = vshll.u32 %v1265_v11, %v242_v22 }
  0xc4   :  { %v264_v39 = vadd.s32 3, %v260_v7  ;;  %v434_v41 = vmul.u32 %v1235_v48, %v418_v24  ;;  %vm436_vm7 = vc.u32 %v1321_v18, %v1304_v57  ;;  %v285_v42 = vadd.s32 1, %v956_v32 }
  0xc5   :  { %v151_v15 = vxor.u32 2147483648, %v150_v19  ;;  %v245_v35 = vshrl.u32 %v1259_v3, %v243_v13  ;;  %v248_v36 = vadd.s32 127, %v247_v23  ;;  %v438_v11 = vsel %vm436_vm7, %v437_v27, %v1305_v61  ;;  %v518_v3 = vpop.permute.xlu1 %517 }
  0xc6   :  { %vm381_vm8 = vcmp.lt.s32.totalorder %v1140_v38, 0  ;;  %v439_v34 = vadd.s32 %v438_v11, %v434_v41  ;;  %v283_v46 = vor.u32 8388608, %v282_v33  ;;  %vm286_vm9 = vcmp.gt.s32.totalorder %v285_v42, 0 }
  0xc7   :  { %v152_v29 = vsel %vm69_vm13, %v151_v15, %v150_v19  ;;  %v246_v14 = vor.u32 %v245_v35, %v244_v31  ;;  %v249_v30 = vshll.u32 %v248_v36, 23  ;;  %v287_v45 = vsel %vm286_vm9, %v285_v42, 0 }
  0xc8   :  { %v155_v2 = vsel %vm1223_vm14, %v1126_v20, %v152_v29  ;;  %v533_v51 = vadd.f32 %v522_v28, %v1246_v55  ;;  %v1344_v53 = vand.u32 3, %v160_v21  ;;  %v440_v16 = vadd.s32 536870912, %v439_v34 }
  0xc9   :  { %1022 = vcosq.f32 %v155_v2  ;;  %v250_v48 = vor.u32 4788187, %v249_v30  ;;  %v289_v58 = vand.u32 31, %v287_v45  ;;  %v512_v43 = vmul.f32 %v1233_v44, %v1262_v6 }
  0xca   :  { %1024 = vsinq.f32 %v155_v2  ;;  %v253_v60 = vcvt.s32.f32 %v246_v14  ;;  %v1348_v61 = vand.u32 3, %v264_v39  ;;  %v1351_v62 = vmul.f32 %v1233_v44, %v502_v5 }
  0xcb   :  { %v251_v59 = vand.u32 2147483647, %v250_v48  ;;  %vm1355_vm10 = vcmp.le.f32.partialorder %v379_v25, 0.7853982  ;;  %v1360_v55 = vadd.s32 %v1304_v57, %v1321_v18  ;;  %v441_v1 = vshrl.u32 %v440_v16, 30  ;;  %v1372_v25 = vpop.permute.xlu1 %709 }
  0xcc   :  { %v290_v4 = vsub.s32 32, %v289_v58  ;;  %v1364_v6 = vmul.f32 %v1233_v44, %v1285_v40  ;;  %v1366_v9 = vshrl.u32 %v287_v45, 5  ;;  %v1368_v5 = vshll.u32 %v283_v46, 8 }
  0xcd   :  { %v254_v7 = vmul.f32 %v253_v60, %v251_v59  ;;  %v1370_v10 = vmul.f32 0.5, %v533_v51  ;;  %vm166_vm11 = vcmp.eq.s32.totalorder %v1344_v53, 2  ;;  %v442_v19 = vshll.u32 %v441_v1, 30 }
  0xce   :  { %v465_v57 = vsub.s32 4, %v441_v1  ;;  %v292_v22 = vshll.u32 %v1071_v47, %v289_v58  ;;  %v293_v8 = vshrl.u32 %v1072_v49, %v290_v4  ;;  %v296_v40 = vshrl.u32 %v1073_v52, %v290_v4 }
  0xcf   :  { %v255_v18 = vxor.u32 2147483648, %v254_v7  ;;  %v299_v13 = vshrl.u32 %v1074_v54, %v290_v4  ;;  %v302_v23 = vshrl.u32 %v1075_v56, %v290_v4  ;;  %v1380_v24 = vsub.s32 %v439_v34, %v442_v19  ;;  %v1400_v2 = vpop.permute.xlu1 %721  ;;  %v714_v34 = vpop.permute.xlu0 %713 }
  0xd0   :  { %v295_v27 = vshll.u32 %v1072_v49, %v289_v58  ;;  %v298_v15 = vshll.u32 %v1073_v52, %v289_v58  ;;  %v301_v21 = vshll.u32 %v1074_v54, %v289_v58  ;;  %v1389_v33 = vsel %vm381_vm8, %v465_v57, %v441_v1 }
  0xd1   :  { %v256_v32 = vsel %vm173_vm15, %v255_v18, %v254_v7  ;;  %v304_v31 = vshll.u32 %v1075_v56, %v289_v58  ;;  %v305_v35 = vshrl.u32 %v1076_v63, %v290_v4  ;;  %v445_v52 = vsub.s32 0, %v1380_v24 }
  0xd2   :  { %v259_v49 = vsel %vm1270_vm1, %v1131_v26, %v256_v32  ;;  %v294_v54 = vor.u32 %v293_v8, %v292_v22  ;;  %v300_v39 = vor.u32 %v299_v13, %v298_v15  ;;  %v297_v42 = vor.u32 %v296_v40, %v295_v27 }
  0xd3   :  { %v1393_v36 = vpop.eup %1022  ;;  %1026 = vcosq.f32 %v259_v49  ;;  %v303_v28 = vor.u32 %v302_v23, %v301_v21  ;;  %v961_v56 = vmin.u32 %v445_v52, %v1380_v24  ;;  %v717_v63 = vmul.f32 %v1233_v44, %v1317_v17  ;;  %v726_v13 = vpop.permute.xlu0 %725 }
  0xd4   :  { %v1025_v29 = vpop.eup %1024  ;;  %v167_v41 = vxor.u32 2147483648, %v1393_v36  ;;  %1028 = vsinq.f32 %v259_v49  ;;  %v532_v12 = vadd.f32 %v518_v3, %v512_v43  ;;  %v468_v14 = vsel %vm1355_vm10, 0, %v1389_v33 }
  0xd5   :  { %v291_v30 = vshrl.u32 %v1071_v47, %v290_v4  ;;  %v306_v11 = vor.u32 %v305_v35, %v304_v31  ;;  %vm310_vm12 = vcmp.lt.s32.totalorder %v1366_v9, 4  ;;  %vm163_vm13 = vcmp.eq.s32.totalorder %v1344_v53, 0  ;;  %v1425_v4 = vpop.permute.xlu1 %505 }
  0xd6   :  { %v164_v46 = vxor.u32 2147483648, %v1025_v29  ;;  %v447_v48 = vclz %v961_v56  ;;  %vm307_vm14 = vcmp.lt.s32.totalorder %v1366_v9, 1  ;;  %v312_v17 = vsel %vm310_vm12, %v300_v39, 2102212464 }
  0xd7   :  { %v168_v3 = vsel %vm166_vm11, %v167_v41, %v1025_v29  ;;  %vm309_vm15 = vcmp.lt.s32.totalorder %v1366_v9, 3  ;;  %v315_v45 = vsel %vm307_vm14, %v294_v54, %v297_v42  ;;  %v316_v47 = vsel %vm310_vm12, %v303_v28, 920167782 }
  0xd8   :  { %v962_v51 = vadd.s32 4294967294, %v447_v48  ;;  %vm308_vm0 = vcmp.lt.s32.totalorder %v1366_v9, 2  ;;  %v311_v16 = vsel %vm307_vm14, %v291_v30, %v294_v54  ;;  %v317_v58 = vsel %vm309_vm15, %v300_v39, %v316_v47  ;;  %v734_v47 = vpop.permute.xlu0 %733 }
  0xd9   :  { %vm162_vm1 = vcmp.lt.s32.totalorder %v1344_v53, 2  ;;  %v313_v43 = vsel %vm309_vm15, %v297_v42, %v312_v17  ;;  %v318_v59 = vsel %vm308_vm0, %v315_v45, %v317_v58  ;;  %v319_v60 = vsel %vm307_vm14, %v297_v42, %v300_v39 }
  0xda   :  { %v320_v1 = vsel %vm310_vm12, %v306_v11, 1326507024  ;;  %vm270_vm2 = vcmp.eq.s32.totalorder %v1348_v61, 2  ;;  %vm963_vm3 = vcmp.lt.s32.totalorder %v962_v51, 0  ;;  %vm267_vm4 = vcmp.eq.s32.totalorder %v1348_v61, 0 }
  0xdb   :  { %v321_v7 = vsel %vm309_vm15, %v303_v28, %v320_v1  ;;  %v1429_v19 = vmul.u32.u64.low %v1368_v5, %v318_v59  ;;  %v1430_v57 = vmul.u32.u64.high %v1368_v5, %v318_v59, %v1429_v19  ;;  %v450_v22 = vsel %vm963_vm3, 0, %v962_v51 }
  0xdc   :  { %v322_v8 = vsel %vm308_vm0, %v319_v60, %v321_v7  ;;  %v1438_v18 = vmul.f32 %v1370_v10, %v1370_v10  ;;  %v536_v40 = vmul.f32 0.5, %v532_v12  ;;  %v451_v23 = vsub.s32 32, %v450_v22 }
  0xdd   :  { %v452_v27 = vshll.u32 %v1380_v24, %v450_v22  ;;  %v455_v15 = vsub.s32 4294967266, %v450_v22  ;;  %v314_v21 = vsel %vm308_vm0, %v311_v16, %v313_v43  ;;  %v1027_v32 = vpop.eup %1026  ;;  %v333_v24 = vadd.s32 1, %v1430_v57 }
  0xde   :  { %v1444_v33 = vmul.u32.u64.low %v1368_v5, %v322_v8  ;;  %v1445_v31 = vmul.u32.u64.high %v1368_v5, %v322_v8, %v1444_v33  ;;  %v1449_v35 = vmul.f32 %v1438_v18, %v1438_v18  ;;  %v1451_v10 = vmul.f32 %v536_v40, %v536_v40  ;;  %v1029_v49 = vpop.eup %1028 }
  0xdf   :  { %v453_v52 = vshrl.u32 %v1360_v55, %v451_v23  ;;  %v456_v54 = vadd.s32 127, %v455_v15  ;;  %v737_v39 = vadd.f32 %v726_v13, %v717_v63  ;;  %vm159_vm5 = vweird.f32 %v1126_v20  ;;  %v526_v55 = vpop.permute.xlu1 %525 }
  0xe0   :  { %v165_v9 = vsel %vm163_vm13, %v1393_v36, %v164_v46  ;;  %v271_v29 = vxor.u32 2147483648, %v1027_v32  ;;  %v1461_v41 = vmul.f32 %v1449_v35, %v1449_v35  ;;  %v1465_v42 = vmul.f32 %v1451_v10, %v1451_v10 }
  0xe1   :  { %v268_v28 = vxor.u32 2147483648, %v1029_v49  ;;  %v454_v56 = vor.u32 %v453_v52, %v452_v27  ;;  %v457_v12 = vshll.u32 %v456_v54, 23  ;;  %v719_v63 = vmul.f32 %v1233_v44, %v714_v34 }
  0xe2   :  { %v472_v30 = vadd.s32 3, %v468_v14  ;;  %v330_v11 = vmul.u32 %v1368_v5, %v314_v21  ;;  %vm332_vm6 = vc.u32 %v1445_v31, %v1429_v19  ;;  %v629_v36 = vmul.f32 -4.299935e-27, %v1461_v41 }
  0xe3   :  { %v169_v46 = vsel %vm162_vm1, %v165_v9, %v168_v3  ;;  %v458_v48 = vor.u32 4788187, %v457_v12  ;;  %vm277_vm7 = vcmp.lt.s32.totalorder %v1216_v37, 0  ;;  %v334_v17 = vsel %vm332_vm6, %v333_v24, %v1430_v57  ;;  %v730_v7 = vpop.permute.xlu1 %729 }
  0xe4   :  { %v1476_v45 = vmul.f32 0.5, %v737_v39  ;;  %vm263_vm9 = vweird.f32 %v1131_v26  ;;  %v272_v5 = vsel %vm270_vm2, %v271_v29, %v1029_v49  ;;  %v335_v14 = vadd.s32 %v334_v17, %v330_v11 }
  0xe5   :  { %v633_v34 = vadd.f32 -8.046258e-18, %v629_v36  ;;  %v1483_v51 = vmul.f32 %v1465_v42, %v1465_v42  ;;  %v269_v53 = vsel %vm267_vm4, %v1027_v32, %v268_v28  ;;  %v459_v3 = vand.u32 2147483647, %v458_v48 }
  0xe6   :  { %v461_v16 = vcvt.s32.f32 %v454_v56  ;;  %v736_v58 = vadd.f32 %v1400_v2, %v1364_v6  ;;  %v336_v43 = vadd.s32 536870912, %v335_v14  ;;  %v739_v1 = vadd.f32 %v734_v47, %v719_v63 }
  0xe7   :  { %v637_v59 = vmul.f32 %v633_v34, %v1461_v41  ;;  %v628_v60 = vmul.f32 -4.299935e-27, %v1483_v51  ;;  %vm266_vm11 = vcmp.lt.s32.totalorder %v1348_v61, 2  ;;  %v1492_v22 = vand.u32 3, %v472_v30  ;;  %v530_v29 = vpop.permute.xlu1 %529 }
  0xe8   :  { %v462_v57 = vmul.f32 %v461_v16, %v459_v3  ;;  %vm1496_vm12 = vcmp.le.f32.partialorder %v275_v50, 0.7853982  ;;  %v337_v40 = vshrl.u32 %v336_v43, 30  ;;  %v1500_v2 = vmul.f32 0.5, %v736_v58 }
  0xe9   :  { %v641_v6 = vadd.f32 -1.0935444e-09, %v637_v59  ;;  %v534_v13 = vadd.f32 %v526_v55, %v1351_v62  ;;  %v1505_v23 = vsel %vm159_vm5, nan, %v169_v46  ;;  %v273_v61 = vsel %vm266_vm11, %v269_v53, %v272_v5 }
  0xea   :  { %v463_v27 = vxor.u32 2147483648, %v462_v57  ;;  %v632_v15 = vadd.f32 -8.046258e-18, %v628_v60  ;;  %v338_v21 = vshll.u32 %v337_v40, 30  ;;  %v361_v32 = vsub.s32 4, %v337_v40 }
  0xeb   :  { %v1509_v50 = vmul.f32 %v1476_v45, %v1476_v45  ;;  %v1511_v33 = vmul.f32 0.5, %v739_v1  ;;  %v645_v62 = vmul.f32 %v641_v6, %v1461_v41  ;;  %v718_v20 = vmul.f32 %v1233_v44, %v1372_v25 }
  0xec   :  { %v464_v49 = vsel %vm381_vm8, %v463_v27, %v462_v57  ;;  %v538_v52 = vmul.f32 0.5, %v534_v13  ;;  %v331_v54 = vadd.s32 %v1429_v19, %v1445_v31  ;;  %v1520_v24 = vsub.s32 %v335_v14, %v338_v21 }
  0xed   :  { %v362_v39 = vsel %vm277_vm7, %v361_v32, %v337_v40  ;;  %v1526_v9 = vmul.f32 %v1500_v2, %v1500_v2  ;;  %v1530_v55 = vsel %vm263_vm9, nan, %v273_v61  ;;  %v636_v25 = vmul.f32 %v632_v15, %v1483_v51 }
  0xee   :  { %v515_v28 = vmul.f32 %v1233_v44, %v1425_v4  ;;  %v1535_v19 = vmul.f32 %v538_v52, %v538_v52  ;;  %v467_v31 = vsel %vm1355_vm10, %v1140_v38, %v464_v49  ;;  %v341_v56 = vsub.s32 0, %v1520_v24 }
  0xef   :  { %v1543_v12 = vmul.f32 %v1509_v50, %v1476_v45  ;;  %v1547_v26 = vmul.f32 %v1511_v33, %v1511_v33  ;;  %v364_v63 = vsel %vm1496_vm12, 0, %v362_v39  ;;  %v649_v44 = vadd.f32 -0.0027777778, %v645_v62 }
  0xf0   :  { %v1553_v4 = vmul.f32 %v1535_v19, %v1535_v19  ;;  %v535_v0 = vadd.f32 %v530_v29, %v515_v28  ;;  %v957_v30 = vmin.u32 %v341_v56, %v1520_v24  ;;  %v738_v36 = vadd.f32 %v730_v7, %v718_v20 }
  0xf1   :  { %v1558_v11 = vmul.f32 %v1547_v26, %v1511_v33  ;;  %v1562_v46 = vmul.f32 %v1526_v9, %v1526_v9  ;;  %v640_v48 = vadd.f32 -1.0935444e-09, %v636_v25  ;;  %v748_v17 = vmul.f32 %v1526_v9, %v1500_v2 }
  0xf2   :  { %v1568_v47 = vmul.f32 %v1553_v4, %v1553_v4  ;;  %v539_v5 = vmul.f32 0.5, %v535_v0  ;;  %1030 = vcosq.f32 %v467_v31  ;;  %v343_v14 = vclz %v957_v30 }
  0xf3   :  { %v368_v34 = vadd.s32 3, %v364_v63  ;;  %v1572_v53 = vmul.f32 %v1562_v46, %v1562_v46  ;;  %1032 = vsinq.f32 %v467_v31  ;;  %v1575_v3 = vmul.f32 %v649_v44, %v1438_v18 }
  0xf4   :  { %v630_v16 = vmul.f32 -4.299935e-27, %v1568_v47  ;;  %v1578_v58 = vmul.f32 %v539_v5, %v539_v5  ;;  %v958_v43 = vadd.s32 4294967294, %v343_v14  ;;  %v1580_v59 = vmul.f32 0.5, %v738_v36 }
  0xf5   :  { %v768_v60 = vmul.f32 2.3947198e-21, %v1572_v53  ;;  %v792_v1 = vmul.f32 -1.0835836e-23, %v1572_v53  ;;  %v644_v7 = vmul.f32 %v640_v48, %v1483_v51  ;;  %v816_v6 = vmul.f32 4.2999347e-26, %v1572_v53 }
  0xf6   :  { %v634_v57 = vadd.f32 -8.046258e-18, %v630_v16  ;;  %v1587_v40 = vmul.f32 %v1578_v58, %v1578_v58  ;;  %vm959_vm8 = vcmp.lt.s32.totalorder %v958_v43, 0  ;;  %v1590_v13 = vand.u32 3, %v368_v34 }
  0xf7   :  { %v796_v61 = vadd.f32 -1.06210605e-14, %v792_v1  ;;  %v840_v27 = vmul.f32 -1.5087491e-28, %v1572_v53  ;;  %v346_v15 = vsel %vm959_vm8, 0, %v958_v43  ;;  %v1599_v52 = vmul.f32 %v1580_v59, %v1580_v59 }
  0xf8   :  { %1848 = vst [vmem:[#allocation5_spill] sm:$0xff] %v1587_v40  ;;  %v1595_v21 = vmul.f32 %v1587_v40, %v1587_v40  ;;  %v772_v32 = vadd.f32 1.2426641e-12, %v768_v60  ;;  %v820_v49 = vadd.f32 7.586472e-17, %v816_v6  ;;  %v347_v62 = vsub.s32 32, %v346_v15 }
  0xf9   :  { %v351_v20 = vsub.s32 4294967266, %v346_v15  ;;  %v752_v39 = vmul.f32 %v748_v17, %v1500_v2  ;;  %v638_v29 = vmul.f32 %v634_v57, %v1568_v47  ;;  %v800_v28 = vmul.f32 %v796_v61, %v1572_v53 }
  0xfa   :  { %v631_v25 = vmul.f32 -4.299935e-27, %v1595_v21  ;;  %v824_v31 = vmul.f32 %v820_v49, %v1572_v53  ;;  %v348_v56 = vshll.u32 %v1520_v24, %v346_v15  ;;  %v349_v63 = vshrl.u32 %v331_v54, %v347_v62 }
  0xfb   :  { %v352_v44 = vadd.s32 127, %v351_v20  ;;  %v844_v0 = vadd.f32 -4.5978617e-19, %v840_v27  ;;  %v776_v36 = vmul.f32 %v772_v32, %v1572_v53  ;;  %v804_v48 = vadd.f32 -5.511464e-07, %v800_v28 }
  0xfc   :  { %v635_v30 = vadd.f32 -8.046258e-18, %v631_v25  ;;  %v828_v5 = vadd.f32 9.185773e-09, %v824_v31  ;;  %v1608_v14 = vpop.eup %1030  ;;  %v350_v2 = vor.u32 %v349_v63, %v348_v56  ;;  %v648_v34 = vadd.f32 -0.0027777778, %v644_v7 }
  0xfd   :  { %v353_v17 = vshll.u32 %v352_v44, 23  ;;  %v848_v16 = vmul.f32 %v844_v0, %v1572_v53  ;;  %v1611_v43 = vpop.eup %1032  ;;  %v642_v60 = vadd.f32 -1.0935444e-09, %v638_v29  ;;  %v1614_v54 = vmul.f32 0.041666668, %v752_v39 }
  0xfe   :  { %v639_v24 = vmul.f32 %v635_v30, %v1595_v21  ;;  %v808_v1 = vmul.f32 %v804_v48, %v1572_v53  ;;  %v750_v6 = vmul.f32 %v1599_v52, %v1580_v59  ;;  %v1620_v27 = vmul.f32 0.5, %v1451_v10 }
  0xff   :  { %v354_v57 = vor.u32 4788187, %v353_v17  ;;  %v852_v61 = vadd.f32 -1.1929575e-10, %v848_v16  ;;  %v357_v7 = vcvt.s32.f32 %v350_v2  ;;  %v780_v15 = vadd.f32 2.4801588e-05, %v776_v36 }
 0x100   :  { %v832_v32 = vmul.f32 %v828_v5, %v1572_v53  ;;  %v1625_v49 = vmul.f32 %v1599_v52, %v1599_v52  ;;  %v556_v39 = vmul.f32 4.7894394e-20, %v1483_v51  ;;  %v580_v29 = vmul.f32 -2.4561228e-22, %v1483_v51 }
 0x101   :  { %v355_v62 = vand.u32 2147483647, %v354_v57  ;;  %v856_v20 = vmul.f32 %v852_v61, %v1572_v53  ;;  %v646_v25 = vmul.f32 %v642_v60, %v1568_v47  ;;  %v643_v28 = vadd.f32 -1.0935444e-09, %v639_v24 }
 0x102   :  { %v812_v31 = vadd.f32 -0.2, %v808_v1  ;;  %v604_v56 = vmul.f32 1.0964833e-24, %v1483_v51  ;;  %v560_v0 = vadd.f32 1.3669305e-11, %v556_v39  ;;  %v784_v36 = vmul.f32 %v780_v15, %v1572_v53 }
 0x103   :  { %v358_v63 = vmul.f32 %v357_v7, %v355_v62  ;;  %v860_v44 = vadd.f32 -0.0007936508, %v856_v20  ;;  %v584_v30 = vadd.f32 -1.3807378e-13, %v580_v29  ;;  %v836_v48 = vadd.f32 0.016666668, %v832_v32 }
 0x104   :  { %v608_v5 = vadd.f32 1.150615e-15, %v604_v56  ;;  %v1635_v2 = vmul.f32 %v1625_v49, %v1625_v49  ;;  %v564_v60 = vmul.f32 %v560_v0, %v1483_v51  ;;  %v647_v1 = vmul.f32 %v643_v28, %v1595_v21 }
 0x105   :  { %v359_v17 = vxor.u32 2147483648, %v358_v63  ;;  %v872_v16 = vmul.f32 %v860_v44, %v1526_v9  ;;  %v588_v24 = vmul.f32 %v584_v30, %v1483_v51  ;;  %v864_v7 = vmul.f32 %v812_v31, %v1526_v9 }
 0x106   :  { %v612_v57 = vmul.f32 %v608_v5, %v1483_v51  ;;  %v770_v61 = vmul.f32 2.3947198e-21, %v1635_v2  ;;  %v794_v53 = vmul.f32 -1.0835836e-23, %v1635_v2  ;;  %v568_v32 = vadd.f32 0.00011574074, %v564_v60 }
 0x107   :  { %v876_v15 = vadd.f32 %v872_v16, %v836_v48  ;;  %v592_v62 = vadd.f32 -3.3068784e-06, %v588_v24  ;;  %v360_v20 = vsel %vm277_vm7, %v359_v17, %v358_v63  ;;  %v660_v44 = vmul.f32 %v648_v34, %v1451_v10 }
 0x108   :  { %v616_v39 = vadd.f32 6.88933e-08, %v612_v57  ;;  %v774_v29 = vadd.f32 1.2426641e-12, %v770_v61  ;;  %v798_v56 = vadd.f32 -1.06210605e-14, %v794_v53  ;;  %v754_v30 = vmul.f32 %v750_v6, %v1580_v59 }
 0x109   :  { %v650_v28 = vadd.f32 -0.0027777778, %v646_v25  ;;  %v788_v0 = vadd.f32 1.0, %v784_v36  ;;  %v651_v5 = vadd.f32 -0.0027777778, %v647_v1  ;;  %v880_v40 = vmul.f32 %v876_v15, %v1562_v46 }
 0x10a   :  { %v778_v9 = vmul.f32 %v774_v29, %v1635_v2  ;;  %v802_v31 = vmul.f32 %v798_v56, %v1635_v2  ;;  %v363_v63 = vsel %vm1496_vm12, %v1216_v37, %v360_v20  ;;  %v572_v17 = vmul.f32 %v568_v32, %v1483_v51 }
 0x10b   :  { %v868_v48 = vadd.f32 %v864_v7, %v788_v0  ;;  %v818_v34 = vmul.f32 4.2999347e-26, %v1635_v2  ;;  %v596_v25 = vmul.f32 %v592_v62, %v1483_v51  ;;  %v620_v59 = vmul.f32 %v616_v39, %v1483_v51 }
 0x10c   :  { %v782_v6 = vadd.f32 2.4801588e-05, %v778_v9  ;;  %v806_v36 = vadd.f32 -5.511464e-07, %v802_v31  ;;  %v1660_v46 = vmul.f32 %v650_v28, %v1535_v19  ;;  %v1662_v16 = vmul.f32 0.041666668, %v754_v30 }
 0x10d   :  { %v822_v60 = vadd.f32 7.586472e-17, %v818_v34  ;;  %v842_v8 = vmul.f32 -1.5087491e-28, %v1635_v2  ;;  %1034 = vcosq.f32 %v363_v63  ;;  %v1666_v24 = vmul.f32 %v651_v5, %v1578_v58 }
 0x10e   :  { %v884_v1 = vadd.f32 %v880_v40, %v868_v48  ;;  %v810_v57 = vmul.f32 %v806_v36, %v1635_v2  ;;  %1036 = vsinq.f32 %v363_v63  ;;  %v1669_v61 = vadd.f32 1.0, %v572_v17 }
 0x10f   :  { %v826_v51 = vmul.f32 %v822_v60, %v1635_v2  ;;  %v846_v53 = vadd.f32 -4.5978617e-19, %v842_v8  ;;  %v600_v7 = vadd.f32 -0.33333334, %v596_v25  ;;  %v624_v15 = vadd.f32 0.041666668, %v620_v59 }
 0x110   :  { %v786_v32 = vmul.f32 %v782_v6, %v1635_v2  ;;  %v557_v62 = vmul.f32 4.7894394e-20, %v1461_v41  ;;  %v581_v29 = vmul.f32 -2.4561228e-22, %v1461_v41  ;;  %v605_v40 = vmul.f32 1.0964833e-24, %v1461_v41 }
 0x111   :  { %v830_v20 = vadd.f32 9.185773e-09, %v826_v51  ;;  %v850_v39 = vmul.f32 %v846_v53, %v1635_v2  ;;  %v1678_v56 = vmul.f32 %v884_v1, %v1614_v54  ;;  %v814_v28 = vadd.f32 -0.2, %v810_v57 }
 0x112   :  { %v561_v0 = vadd.f32 1.3669305e-11, %v557_v62  ;;  %v755_v30 = vmul.f32 %v1558_v11, %v1511_v33  ;;  %v585_v31 = vadd.f32 -1.3807378e-13, %v581_v29  ;;  %v609_v63 = vadd.f32 1.150615e-15, %v605_v40 }
 0x113   :  { %v834_v5 = vmul.f32 %v830_v20, %v1635_v2  ;;  %v854_v9 = vadd.f32 -1.1929575e-10, %v850_v39  ;;  %v664_v48 = vadd.f32 %v660_v44, %v624_v15  ;;  %v1684_v17 = vmul.f32 0.5, %v1438_v18 }
 0x114   :  { %v565_v34 = vmul.f32 %v561_v0, %v1461_v41  ;;  %v1689_v54 = vmul.f32 %v1547_v26, %v1547_v26  ;;  %v790_v25 = vadd.f32 1.0, %v786_v32  ;;  %v589_v33 = vmul.f32 %v585_v31, %v1461_v41 }
 0x115   :  { %v858_v59 = vmul.f32 %v854_v9, %v1635_v2  ;;  %v613_v11 = vmul.f32 %v609_v63, %v1461_v41  ;;  %v838_v6 = vadd.f32 0.016666668, %v834_v5  ;;  %v866_v36 = vmul.f32 %v814_v28, %v1599_v52 }
 0x116   :  { %v569_v44 = vadd.f32 0.00011574074, %v565_v34  ;;  %v767_v60 = vmul.f32 %v1689_v54, %v1689_v54  ;;  %v652_v8 = vmul.f32 %v600_v7, %v1451_v10  ;;  %v593_v57 = vadd.f32 -3.3068784e-06, %v589_v33 }
 0x117   :  { %v862_v1 = vadd.f32 -0.0007936508, %v858_v59  ;;  %v617_v51 = vadd.f32 6.88933e-08, %v613_v11  ;;  %v1698_v53 = vpop.eup %1034  ;;  %v1703_v62 = vmul.f32 %v1509_v50, %v1509_v50  ;;  %v668_v40 = vmul.f32 %v664_v48, %v1465_v42 }
 0x118   :  { %v573_v2 = vmul.f32 %v569_v44, %v1461_v41  ;;  %v771_v15 = vmul.f32 2.3947198e-21, %v767_v60  ;;  %v795_v32 = vmul.f32 -1.0835836e-23, %v767_v60  ;;  %v1705_v20 = vpop.eup %1036  ;;  %v597_v29 = vmul.f32 %v593_v57, %v1461_v41 }
 0x119   :  { %v874_v39 = vmul.f32 %v862_v1, %v1599_v52  ;;  %v621_v10 = vmul.f32 %v617_v51, %v1461_v41  ;;  %v819_v7 = vmul.f32 4.2999347e-26, %v767_v60  ;;  %v870_v28 = vadd.f32 %v866_v36, %v790_v25 }
 0x11a   :  { %v775_v0 = vadd.f32 1.2426641e-12, %v771_v15  ;;  %v799_v5 = vadd.f32 -1.06210605e-14, %v795_v32  ;;  %v601_v31 = vadd.f32 -0.33333334, %v597_v29  ;;  %v1713_v52 = vmul.f32 %v1703_v62, %v1703_v62 }
 0x11b   :  { %v878_v9 = vadd.f32 %v874_v39, %v838_v6  ;;  %v625_v63 = vadd.f32 0.041666668, %v621_v10  ;;  %v823_v34 = vadd.f32 7.586472e-17, %v819_v7  ;;  %v843_v11 = vmul.f32 -1.5087491e-28, %v767_v60  ;;  %v894_v39 = vpop.permute.xlu0 %893 }
 0x11c   :  { %v779_v59 = vmul.f32 %v775_v0, %v767_v60  ;;  %v803_v33 = vmul.f32 %v799_v5, %v767_v60  ;;  %v577_v41 = vadd.f32 1.0, %v573_v2  ;;  %v753_v42 = vmul.f32 %v1543_v12, %v1476_v45 }
 0x11d   :  { %v882_v44 = vmul.f32 %v878_v9, %v1625_v49  ;;  %v827_v1 = vmul.f32 %v823_v34, %v767_v60  ;;  %v653_v48 = vmul.f32 %v601_v31, %v1438_v18  ;;  %v847_v36 = vadd.f32 -4.5978617e-19, %v843_v11 }
 0x11e   :  { %v783_v25 = vadd.f32 2.4801588e-05, %v779_v59  ;;  %v807_v6 = vadd.f32 -5.511464e-07, %v803_v33  ;;  %v656_v57 = vadd.f32 %v652_v8, %v1669_v61  ;;  %v665_v15 = vadd.f32 %v1575_v3, %v625_v63 }
 0x11f   :  { %v886_v51 = vadd.f32 %v882_v44, %v870_v28  ;;  %v831_v32 = vadd.f32 9.185773e-09, %v827_v1  ;;  %v851_v49 = vmul.f32 %v847_v36, %v767_v60  ;;  %v769_v2 = vmul.f32 2.3947198e-21, %v1713_v52 }
 0x120   :  { %v787_v29 = vmul.f32 %v783_v25, %v767_v60  ;;  %v811_v10 = vmul.f32 %v807_v6, %v767_v60  ;;  %v1723_v7 = vmul.f32 %v894_v39, %v1678_v56  ;;  %v1725_v45 = vadd.f32 %v668_v40, %v656_v57 }
 0x121   :  { %v1727_v18 = vmul.f32 0.041666668, %v755_v30  ;;  %v793_v12 = vmul.f32 -1.0835836e-23, %v1713_v52  ;;  %v657_v61 = vadd.f32 %v653_v48, %v577_v41  ;;  %v835_v8 = vmul.f32 %v831_v32, %v767_v60 }
 0x122   :  { %v855_v28 = vadd.f32 -1.1929575e-10, %v851_v49  ;;  %v1730_v3 = vmul.f32 0.041666668, %v753_v42  ;;  %v1733_v0 = vmul.f32 %v886_v51, %v1662_v16  ;;  %v669_v5 = vmul.f32 %v665_v15, %v1449_v35 }
 0x123   :  { %v791_v9 = vadd.f32 1.0, %v787_v29  ;;  %v773_v31 = vadd.f32 1.2426641e-12, %v769_v2  ;;  %v815_v56 = vadd.f32 -0.2, %v811_v10  ;;  %v1740_v33 = vmul.f32 0.5, %v1535_v19 }
 0x124   :  { %v859_v63 = vmul.f32 %v855_v28, %v767_v60  ;;  %v797_v40 = vadd.f32 -1.06210605e-14, %v793_v12  ;;  %v817_v30 = vmul.f32 4.2999347e-26, %v1713_v52  ;;  %v841_v59 = vmul.f32 -1.5087491e-28, %v1713_v52 }
 0x125   :  { %v777_v34 = vmul.f32 %v773_v31, %v1713_v52  ;;  %v558_v11 = vmul.f32 4.7894394e-20, %v1568_v47  ;;  %v839_v16 = vadd.f32 0.016666668, %v835_v8  ;;  %v673_v1 = vadd.f32 %v669_v5, %v657_v61 }
 0x126   :  { %v863_v44 = vadd.f32 -0.0007936508, %v859_v63  ;;  %v801_v35 = vmul.f32 %v797_v40, %v1713_v52  ;;  %v821_v41 = vadd.f32 7.586472e-17, %v817_v30  ;;  %v845_v60 = vadd.f32 -4.5978617e-19, %v841_v59  ;;  %v1761_v59 = vpop.permute.xlu1 %681 }
 0x127   :  { %v781_v42 = vadd.f32 2.4801588e-05, %v777_v34  ;;  %v562_v48 = vadd.f32 1.3669305e-11, %v558_v11  ;;  %v582_v57 = vmul.f32 -2.4561228e-22, %v1568_v47  ;;  %v867_v51 = vmul.f32 %v815_v56, %v1547_v26 }
 0x128   :  { %v875_v25 = vmul.f32 %v863_v44, %v1547_v26  ;;  %v805_v6 = vadd.f32 -5.511464e-07, %v801_v35  ;;  %v825_v36 = vmul.f32 %v821_v41, %v1713_v52  ;;  %v849_v15 = vmul.f32 %v845_v60, %v1713_v52 }
 0x129   :  { %v566_v32 = vmul.f32 %v562_v48, %v1568_v47  ;;  %v606_v39 = vmul.f32 1.0964833e-24, %v1568_v47  ;;  %v586_v2 = vadd.f32 -1.3807378e-13, %v582_v57  ;;  %v1753_v12 = vmul.f32 %v673_v1, %v1684_v17 }
 0x12a   :  { %v879_v29 = vadd.f32 %v875_v25, %v839_v16  ;;  %v809_v10 = vmul.f32 %v805_v6, %v1713_v52  ;;  %v829_v49 = vadd.f32 9.185773e-09, %v825_v36  ;;  %v785_v61 = vmul.f32 %v781_v42, %v1713_v52 }
 0x12b   :  { %v853_v8 = vadd.f32 -1.1929575e-10, %v849_v15  ;;  %v570_v28 = vadd.f32 0.00011574074, %v566_v32  ;;  %v590_v56 = vmul.f32 %v586_v2, %v1568_v47  ;;  %v871_v63 = vadd.f32 %v867_v51, %v791_v9 }
 0x12c   :  { %v883_v26 = vmul.f32 %v879_v29, %v1689_v54  ;;  %v813_v5 = vadd.f32 -0.2, %v809_v10  ;;  %v833_v31 = vmul.f32 %v829_v49, %v1713_v52  ;;  %v610_v30 = vadd.f32 1.150615e-15, %v606_v39  ;;  %v686_v10 = vpop.permute.xlu1 %685 }
 0x12d   :  { %v857_v40 = vmul.f32 %v853_v8, %v1713_v52  ;;  %v559_v34 = vmul.f32 4.7894394e-20, %v1595_v21  ;;  %v574_v11 = vmul.f32 %v570_v28, %v1568_v47  ;;  %v594_v16 = vadd.f32 -3.3068784e-06, %v590_v56 }
 0x12e   :  { %v865_v17 = vmul.f32 %v813_v5, %v1509_v50  ;;  %v1767_v54 = vadd.f32 %v1530_v55, %v1505_v23  ;;  %v789_v44 = vadd.f32 1.0, %v785_v61  ;;  %v614_v9 = vmul.f32 %v610_v30, %v1568_v47 }
 0x12f   :  { %v861_v35 = vadd.f32 -0.0007936508, %v857_v40  ;;  %v563_v41 = vadd.f32 1.3669305e-11, %v559_v34  ;;  %v1770_v52 = vadd.f32 %v883_v26, %v871_v63  ;;  %v837_v1 = vadd.f32 0.016666668, %v833_v31 }
 0x130   :  { %v598_v42 = vmul.f32 %v594_v16, %v1568_v47  ;;  %v583_v60 = vmul.f32 -2.4561228e-22, %v1595_v21  ;;  %v618_v25 = vadd.f32 6.88933e-08, %v614_v9  ;;  %v607_v23 = vmul.f32 1.0964833e-24, %v1595_v21  ;;  %v898_v16 = vpop.permute.xlu1 %897 }
 0x131   :  { %v873_v48 = vmul.f32 %v861_v35, %v1509_v50  ;;  %v567_v6 = vmul.f32 %v563_v41, %v1595_v21  ;;  %v869_v55 = vadd.f32 %v865_v17, %v789_v44  ;;  %v578_v36 = vadd.f32 1.0, %v574_v11 }
 0x132   :  { %v602_v57 = vadd.f32 -0.33333334, %v598_v42  ;;  %v587_v51 = vadd.f32 -1.3807378e-13, %v583_v60  ;;  %vm367_vm10 = vweird.f32 %v1216_v37  ;;  %v622_v32 = vmul.f32 %v618_v25, %v1568_v47 }
 0x133   :  { %v877_v15 = vadd.f32 %v873_v48, %v837_v1  ;;  %v571_v39 = vadd.f32 0.00011574074, %v567_v6  ;;  %v611_v29 = vadd.f32 1.150615e-15, %v607_v23  ;;  %vm371_vm13 = vcmp.eq.s32.totalorder %v1590_v13, 0 }
 0x134   :  { %v654_v49 = vmul.f32 %v602_v57, %v1535_v19  ;;  %v591_v50 = vmul.f32 %v587_v51, %v1595_v21  ;;  %v372_v2 = vxor.u32 2147483648, %v1705_v20  ;;  %v626_v8 = vadd.f32 0.041666668, %v622_v32 }
 0x135   :  { %v881_v61 = vmul.f32 %v877_v15, %v1703_v62  ;;  %v575_v28 = vmul.f32 %v571_v39, %v1595_v21  ;;  %v615_v26 = vmul.f32 %v611_v29, %v1595_v21  ;;  %vm370_vm14 = vcmp.lt.s32.totalorder %v1590_v13, 2 }
 0x136   :  { %v658_v5 = vadd.f32 %v654_v49, %v578_v36  ;;  %v595_v47 = vadd.f32 -3.3068784e-06, %v591_v50  ;;  %v373_v31 = vsel %vm371_vm13, %v1698_v53, %v372_v2  ;;  %v666_v56 = vadd.f32 %v1660_v46, %v626_v8  ;;  %v1849_v36 = vld [vmem:[#allocation5_spill] sm:$0xff] }
 0x137   :  { %v885_v19 = vadd.f32 %v881_v61, %v869_v55  ;;  %v619_v63 = vadd.f32 6.88933e-08, %v615_v26  ;;  %vm374_vm15 = vcmp.eq.s32.totalorder %v1590_v13, 2  ;;  %v579_v40 = vadd.f32 1.0, %v575_v28  ;;  %v690_v55 = vpop.permute.xlu1 %689 }
 0x138   :  { %v599_v62 = vmul.f32 %v595_v47, %v1595_v21  ;;  %v375_v30 = vxor.u32 2147483648, %v1698_v53  ;;  %vm474_vm0 = vcmp.lt.s32.totalorder %v1492_v22, 2  ;;  %v670_v34 = vmul.f32 %v666_v56, %v1553_v4  ;;  %v902_v4 = vpop.permute.xlu0 %901 }
 0x139   :  { %v623_v17 = vmul.f32 %v619_v63, %v1595_v21  ;;  %vm475_vm1 = vcmp.eq.s32.totalorder %v1492_v22, 0  ;;  %v476_v11 = vxor.u32 2147483648, %v1611_v43  ;;  %v889_v46 = vmul.f32 %v885_v19, %v1730_v3 }
 0x13a   :  { %v603_v44 = vadd.f32 -0.33333334, %v599_v62  ;;  %v376_v35 = vsel %vm374_vm15, %v375_v30, %v1705_v20  ;;  %v479_v9 = vxor.u32 2147483648, %v1608_v14  ;;  %v674_v41 = vadd.f32 %v670_v34, %v658_v5 }
 0x13b   :  { %v627_v53 = vadd.f32 0.041666668, %v623_v17  ;;  %v377_v1 = vsel %vm370_vm14, %v373_v31, %v376_v35  ;;  %vm478_vm2 = vcmp.eq.s32.totalorder %v1492_v22, 2  ;;  %v477_v3 = vsel %vm475_vm1, %v1608_v14, %v476_v11  ;;  %v694_v29 = vpop.permute.xlu1 %693 }
 0x13c   :  { %v655_v21 = vmul.f32 %v603_v44, %v1578_v58  ;;  %v378_v42 = vsel %vm367_vm10, nan, %v377_v1  ;;  %v480_v60 = vsel %vm478_vm2, %v479_v9, %v1611_v43  ;;  %v909_v20 = vmul.f32 %v898_v16, %v889_v46 }
 0x13d   :  { %v678_v48 = vmul.f32 %v674_v41, %v1740_v33  ;;  %v667_v25 = vadd.f32 %v1666_v24, %v627_v53  ;;  %v481_v13 = vsel %vm474_vm0, %v477_v3, %v480_v60  ;;  %v676_v6 = vmul.f32 %v1725_v45, %v1620_v27 }
 0x13e   :  { %v910_v23 = vmul.f32 %v902_v4, %v1733_v0  ;;  %vm471_vm3 = vweird.f32 %v1140_v38  ;;  %v484_v37 = vadd.f32 %v1767_v54, %v378_v42  ;;  %v697_v14 = vmul.f32 %v686_v10, %v1753_v12  ;;  %v906_v38 = vpop.permute.xlu0 %905 }
 0x13f   :  { %v659_v43 = vadd.f32 %v655_v21, %v579_v40  ;;  %v671_v33 = vmul.f32 %v667_v25, %v1849_v36  ;;  %v482_v57 = vsel %vm471_vm3, nan, %v481_v13  ;;  %v696_v24 = vmul.f32 %v1761_v59, %v676_v6  ;;  %v929_v56 = vpop.permute.xlu1 %928 }
 0x140   :  { %v547_v22 = vmul.f32 0.5, %v1578_v58  ;;  %v485_v51 = vadd.f32 %v484_v37, %v482_v57  ;;  %v891_v27 = vmul.f32 %v1770_v52, %v1727_v18  ;;  %v913_v45 = vadd.f32 %v909_v20, %v697_v14 }
 0x141   :  { %v698_v0 = vmul.f32 %v690_v55, %v678_v48  ;;  %v675_v15 = vadd.f32 %v671_v33, %v659_v43  ;;  %v912_v54 = vadd.f32 %v1723_v7, %v696_v24 }
 0x142   :  { %v486_v32 = vrot.slane %v485_v51, 4  ;;  %v911_v49 = vmul.f32 %v906_v38, %v891_v27 }
 0x143   :  { %v914_v12 = vadd.f32 %v910_v23, %v698_v0  ;;  %v679_v39 = vmul.f32 %v675_v15, %v547_v22  ;;  %v916_v50 = vadd.f32 %v913_v45, %v912_v54 }
 0x144   :  { %v487_v10 = vadd.f32 %v486_v32, %v485_v51 }
 0x145   :  { %v699_v59 = vmul.f32 %v694_v29, %v679_v39  ;;  %v917_v2 = vadd.f32 %v916_v50, %v914_v12 }
 0x146   :  { %v488_v61 = vrot.slane %v487_v10, 2 }
 0x147   :  { %v915_v58 = vadd.f32 %v911_v49, %v699_v59 }
 0x148   :  { %v489_v18 = vadd.f32 %v488_v61, %v487_v10 }
 0x149   :  { %v918_v8 = vadd.f32 %v917_v2, %v915_v58 }
 0x14a   :  { %v490_v26 = vrot.slane %v489_v18, 1 }
 0x14b   :  { %v919_v28 = vrot.slane %v918_v8, 4 }
 0x14c   :  { %v491_v31 = vadd.f32 %v490_v26, %v489_v18 }
 0x14d   :  { %v920_v52 = vadd.f32 %v919_v28, %v918_v8 }
 0x14f   :  { %v921_v5 = vrot.slane %v920_v52, 2 }
 0x151   :  { %v922_v47 = vadd.f32 %v921_v5, %v920_v52 }
 0x153   :  { %v923_v19 = vrot.slane %v922_v47, 1 }
 0x155   :  { %v924_v7 = vadd.f32 %v923_v19, %v922_v47 }
 0x157   :  { %v925_v63 = vmul.f32 %v924_v7, %v491_v31 }
 0x159   :  { %v931_v40 = vadd.f32 %v929_v56, %v925_v63 }
 0x15b   :  { %932 = vst [vmem:[#allocation2] sm:$0x1] %v931_v40 }
 0x15c   :  { %1049 = shalt.err (!%p1046_p4)
}
 0x15d   :  { %s1050_s27 = scalar_lea.hbm %s1838_s2, 16 }
 0x15e   :  { %p1051_p5 = scmp.ne.s32.totalorder %s1838_s2, %s1050_s27  ;;  %p1054_p6 = scmp.lt.u32.totalorder %s1050_s27, %s1838_s2 }
 0x160   :  { %p1056_p7 = pnand %p1054_p6, %p1051_p5 }
 0x162   :  { %1059 = shalt.err (!%p1056_p7)
}
 0x163   :  { %942 = dma.vmem_to_hbm [thread:$0]  %s940_s22, 16, %s1838_s2, [#allocation3]  }
 0x164   :  { %1060 = dma.done.wait [#allocation3], 16  }
 0x165   :  { %1061 = vsyncadd [#allocation3], 4294967280 }
 0x166   :  { %946 = vsyncpa [#allocation3], 1 }

</bundles_post_ra>
